<compile_context>
chip_gen: v5e
topology: v5e:2x2
jax: 0.10.0
libtpu: 0.0.40
codegen_flags: <defaults>
</compile_context>

<pallas_src>
import jax
import jax.numpy as jnp
from jax.experimental import pallas as pl
from jax.experimental.pallas import tpu as pltpu


def _round_up(x, m):
    return ((x + m - 1) // m) * m


def _matmul_kernel(x_ref, w_ref, o_ref, acc_ref):
    # x_ref: (tm, tk), w_ref: (tk, tn), o_ref: (tm, tn), acc_ref: f32 (tm, tn)
    k = pl.program_id(2)

    @pl.when(k == 0)
    def _():
        acc_ref[...] = jnp.zeros_like(acc_ref)

    acc_ref[...] += jnp.dot(
        x_ref[...], w_ref[...], preferred_element_type=jnp.float32
    )

    @pl.when(k == pl.num_programs(2) - 1)
    def _():
        o_ref[...] = acc_ref[...].astype(o_ref.dtype)


def _pallas_matmul(x, w_t, *, tm=256, tn=256, tk=512):
    """x: (M, K), w_t: (K, N) -> (M, N) via a tiled Pallas matmul."""
    M, K = x.shape
    K2, N = w_t.shape
    assert K == K2

    # Clamp tiles to (padded) problem size; keep tn lane-dense (mult. of 128)
    # and tm sublane-aligned (mult. of 8).
    tm = min(tm, _round_up(M, 8))
    tn = min(tn, _round_up(N, 128))
    tk = min(tk, _round_up(K, 128))

    Mp, Np, Kp = _round_up(M, tm), _round_up(N, tn), _round_up(K, tk)
    if (Mp, Kp) != (M, K):
        x = jnp.pad(x, ((0, Mp - M), (0, Kp - K)))
    if (Kp, Np) != (K, N):
        w_t = jnp.pad(w_t, ((0, Kp - K), (0, Np - N)))

    out = pl.pallas_call(
        _matmul_kernel,
        out_shape=jax.ShapeDtypeStruct((Mp, Np), x.dtype),
        grid_spec=pltpu.PrefetchScalarGridSpec(
            num_scalar_prefetch=0,
            grid=(Mp // tm, Np // tn, Kp // tk),
            in_specs=[
                pl.BlockSpec((tm, tk), lambda i, j, k: (i, k)),
                pl.BlockSpec((tk, tn), lambda i, j, k: (k, j)),
            ],
            out_specs=pl.BlockSpec((tm, tn), lambda i, j, k: (i, j)),
            scratch_shapes=[pltpu.VMEM((tm, tn), jnp.float32)],
        ),
        compiler_params=pltpu.CompilerParams(
            dimension_semantics=("parallel", "parallel", "arbitrary"),
            vmem_limit_bytes=32 * 1024 * 1024,
        ),
    )(x, w_t)

    if (Mp, Np) != (M, N):
        out = out[:M, :N]
    return out


# Below this many MACs, XLA's fused matmul beats any hand kernel (launch +
# per-step overhead dominates, and narrow outputs force masked stores).
_SMALL_PROBLEM_MACS = 1 << 22


def error_dfa_forward(x, weight, *, force_pallas=False):
    """Pallas implementation of ErrorDFA.forward.

    PyTorch semantics: output = inputs.mm(weight.t()); bias defaults to None
    in ErrorDFA.__init__, so there is no bias add.
    """
    B, in_features = x.shape
    out_features, in_features_w = weight.shape
    assert in_features == in_features_w

    # One-time layout fix in the wrapper: contract (M,K)x(K,N) on the MXU so
    # no per-tile transpose of the weight tile is needed inside the kernel.
    w_t = weight.T

    if (not force_pallas) and (B * out_features * in_features <= _SMALL_PROBLEM_MACS):
        return (x @ w_t).astype(x.dtype)

    # TODO(synk): optionally cast x / w_t to bf16 (f32 accumulate) on v6e/v7x
    # when the DFA use-case tolerates it; kept f32 here to match PyTorch.
    return _pallas_matmul(x, w_t)


def kaiming_uniform(key, shape, fan_in):
    # torch.nn.init.kaiming_uniform_ default: gain=sqrt(2), bound=gain*sqrt(3/fan_in)
    bound = jnp.sqrt(6.0 / fan_in)
    return jax.random.uniform(key, shape, dtype=jnp.float32, minval=-bound, maxval=bound)


if __name__ == "__main__":
    key = jax.random.PRNGKey(0)
    k_x, k_w, k_rm, k_x2, k_w2 = jax.random.split(key, 5)

    # --- Pallas path: modest shapes that exercise tiling + N padding ---------
    batch, in_features, out_features = 256, 512, 384
    x = jax.random.normal(k_x, (batch, in_features), dtype=jnp.float32)
    weight = kaiming_uniform(k_w, (out_features, in_features), fan_in=in_features)
    # random_matrix is only used in the DFA backward pass; not needed here.
    random_matrix = kaiming_uniform(k_rm, (out_features, in_features), fan_in=in_features)

    out = error_dfa_forward(x, weight, force_pallas=True)
    out = jax.block_until_ready(out)
    ref = x @ weight.T
    assert out.shape == (batch, out_features)
    assert jnp.allclose(out, ref, atol=1e-4, rtol=1e-4), "pallas path mismatch"

    # --- Tiny module-default shape: dispatches to the jnp.dot fallback -------
    b2, in2, out2 = 8, 32, 16
    x_small = jax.random.normal(k_x2, (b2, in2), dtype=jnp.float32)
    w_small = kaiming_uniform(k_w2, (out2, in2), fan_in=in2)
    out_small = jax.block_until_ready(error_dfa_forward(x_small, w_small))
    assert out_small.shape == (b2, out2)
    assert jnp.allclose(out_small, x_small @ w_small.T, atol=1e-5, rtol=1e-5)

    print("KERNEL_OK")
</pallas_src>

<mosaic_0001>
module attributes {stable_mosaic.version = 11 : i64} {
  func.func @_matmul_kernel(%arg0: i32, %arg1: i32, %arg2: i32, %arg3: memref<256x512xf32, #tpu.memory_space<vmem>>, %arg4: memref<512x256xf32, #tpu.memory_space<vmem>>, %arg5: memref<256x256xf32, #tpu.memory_space<vmem>>, %arg6: memref<256x256xf32, #tpu.memory_space<vmem>>) attributes {dimension_semantics = [#tpu.dimension_semantics<parallel>, #tpu.dimension_semantics<parallel>, #tpu.dimension_semantics<arbitrary>], iteration_bounds = array<i64: 1, 2, 1>, scalar_prefetch = 0 : i64, scratch_operands = 1 : i64, tpu.core_type = #tpu.core_type<tc>, window_params = [{transform_indices = @transform_0, window_bounds = array<i64: 256, 512>}, {transform_indices = @transform_1, window_bounds = array<i64: 512, 256>}, {transform_indices = @transform_2, window_bounds = array<i64: 256, 256>}]} {
    %c0_i32 = arith.constant 0 : i32
    %0 = arith.cmpi eq, %arg2, %c0_i32 : i32
    %1 = arith.extui %0 : i1 to i32
    %c0_i32_0 = arith.constant 0 : i32
    %2 = arith.cmpi ne, %1, %c0_i32_0 : i32
    scf.if %2 {
      %cst_10 = arith.constant 0.000000e+00 : f32
      %12 = vector.broadcast %cst_10 : f32 to vector<256x256xf32>
      %c0_11 = arith.constant 0 : index
      %c0_12 = arith.constant 0 : index
      %13 = vector.load %arg6[%c0_11, %c0_12] : memref<256x256xf32, #tpu.memory_space<vmem>>, vector<256x256xf32>
      tpu.vector_store %arg6[%c0_11, %c0_12], %12 {strides = array<i32>} : memref<256x256xf32, #tpu.memory_space<vmem>>, vector<256x256xf32>,
    } else {
    }
    %c0 = arith.constant 0 : index
    %c0_1 = arith.constant 0 : index
    %3 = vector.load %arg6[%c0, %c0_1] : memref<256x256xf32, #tpu.memory_space<vmem>>, vector<256x256xf32>
    %c0_2 = arith.constant 0 : index
    %c0_3 = arith.constant 0 : index
    %4 = vector.load %arg3[%c0_2, %c0_3] : memref<256x512xf32, #tpu.memory_space<vmem>>, vector<256x512xf32>
    %c0_4 = arith.constant 0 : index
    %c0_5 = arith.constant 0 : index
    %5 = vector.load %arg4[%c0_4, %c0_5] : memref<512x256xf32, #tpu.memory_space<vmem>>, vector<512x256xf32>
    %cst = arith.constant dense<0.000000e+00> : vector<256x256xf32>
    %6 = tpu.matmul %4, %5, %cst {dimension_numbers = #tpu.dot_dimension_numbers<[1], [0], [0], [1], [0, 0, 1, 1], [], []>} : vector<256x512xf32>, vector<512x256xf32>, vector<256x256xf32> -> vector<256x256xf32>
    %7 = arith.addf %3, %6 : vector<256x256xf32>
    %c0_6 = arith.constant 0 : index
    %c0_7 = arith.constant 0 : index
    %8 = vector.load %arg6[%c0_6, %c0_7] : memref<256x256xf32, #tpu.memory_space<vmem>>, vector<256x256xf32>
    tpu.vector_store %arg6[%c0_6, %c0_7], %7 {strides = array<i32>} : memref<256x256xf32, #tpu.memory_space<vmem>>, vector<256x256xf32>,
    %c0_i32_8 = arith.constant 0 : i32
    %9 = arith.cmpi eq, %arg2, %c0_i32_8 : i32
    %10 = arith.extui %9 : i1 to i32
    %c0_i32_9 = arith.constant 0 : i32
    %11 = arith.cmpi ne, %10, %c0_i32_9 : i32
    scf.if %11 {
      %c0_10 = arith.constant 0 : index
      %c0_11 = arith.constant 0 : index
      %12 = vector.load %arg6[%c0_10, %c0_11] : memref<256x256xf32, #tpu.memory_space<vmem>>, vector<256x256xf32>
      %c0_12 = arith.constant 0 : index
      %c0_13 = arith.constant 0 : index
      %13 = vector.load %arg5[%c0_12, %c0_13] : memref<256x256xf32, #tpu.memory_space<vmem>>, vector<256x256xf32>
      tpu.vector_store %arg5[%c0_12, %c0_13], %12 {strides = array<i32>} : memref<256x256xf32, #tpu.memory_space<vmem>>, vector<256x256xf32>,
    } else {
    }
    return
  }
  func.func @transform_0(%arg0: i32, %arg1: i32, %arg2: i32) -> (i32, i32) {
    %c0_i32 = arith.constant 0 : i32
    return %arg0, %arg2 : i32, i32
  }
  func.func @transform_1(%arg0: i32, %arg1: i32, %arg2: i32) -> (i32, i32) {
    %c0_i32 = arith.constant 0 : i32
    return %arg2, %arg1 : i32, i32
  }
  func.func @transform_2(%arg0: i32, %arg1: i32, %arg2: i32) -> (i32, i32) {
    %c0_i32 = arith.constant 0 : i32
    return %arg0, %arg1 : i32, i32
  }
}

</mosaic_0001>

<bundles_post_ra>
// kernel: tpu_custom_call.1
= control target key start
LH: loop header
LB: loop body
LE: loop exit
PB: predicated region body
PF: predicated region fallthrough
CT: control target
= control target key end

     0   :  { %7 = vsyncpa [#allocation4], 0  ;;  %s3023_s0 = inlined_call_operand.hbm [shape: f32[256,512], index: 0, kind: input, shape index: {}]   ;;  %s3024_s1 = inlined_call_operand.hbm [shape: f32[512,512], index: 1, kind: input, shape index: {}]   ;;  %s3025_s2 = inlined_call_operand.hbm [shape: f32[256,512], index: 2, kind: output, shape index: {}]  }
   0x1   :  { %8 = vsyncpa [#allocation7], 0 }
   0x2   :  { %10 = vsyncpa [#allocation7 + $0x1], 0 }
   0x3   :  { %11 = vsyncpa [#allocation5], 0 }
   0x4   :  { %13 = vsyncpa [#allocation5 + $0x1], 0  ;;  %s2177_s9 = smov 0   ;;  %s2179_s10 = smov 0  }
   0x5   :  { %s2181_s11 = smov 0   ;;  %s2183_s12 = smov 0  }
   0x6   :  { %s2185_s13 = smov 0   ;;  %s2187_s14 = smov 0  }
   0x7 LB: > { %s1903_s15 = sadd.s32 4294967295, %s2152_s14   ;;  %s1904_s16 = sadd.s32 4294967294, %s2152_s14   ;;  %s2152_s14 = sphi %s2187_s14, %s19_s14   ;;  %s2148_s13 = sphi %s2185_s13, %s3267_s13   ;;  %s2144_s12 = sphi %s2183_s12, %s3266_s12   ;;  %s2140_s11 = sphi %s2181_s11, %s3265_s11   ;;  %s2136_s10 = sphi %s2179_s10, %s3264_s10   ;;  %s2132_s9 = sphi %s2177_s9, %s3263_s9  }
   0x8   : > { %p88_p0 = scmp.ne.s32.totalorder %s2136_s10, %s2132_s9  ;;  %p2211_p1 = scmp.eq.s32.totalorder %s1903_s15, 0 }
   0x9   : > { %p2215_p2 = scmp.eq.s32.totalorder %s1903_s15, 1  ;;  %p120_p3 = scmp.eq.s32.totalorder %s1904_s16, 1 }
   0xa   : > { %p2221_p4 = por %p2211_p1, %p88_p0  ;;  %p1905_p5 = scmp.ge.s32.totalorder %s2152_s14, 1 }
   0xb   : > { %p2226_p6 = por %p120_p3, %p88_p0  ;;  %p127_p7 = scmp.lt.s32.totalorder %s2152_s14, 3 }
   0xc   : > { %s144_s23 = sshll.u32 %s3023_s0, 4  ;;  %s2154_s25 = smov [#allocation3]   ;;  %s145_s23 = int_to_ptr.hbm [resolvable:$true] %s144_s23 }
   0xd   : > { %p2234_p8 = pnand %p1905_p5, %p127_p7  ;;  %s146_s26 = sshll.u32 %s2154_s25, 4  ;;  %s147_s26 = int_to_ptr.vmem [resolvable:$true] %s146_s26 }
   0xe   : > { %p1907_p11 = scmp.ge.s32.totalorder %s2152_s14, 2  ;;  %s3026_s27 = smov 512  }
   0xf   : > { %p1930_p9 = pneg %p2234_p8  ;;  %s2156_s28 = smov 32  }
  0x10   : > { %s34_s29 = sadd.s32 1, %s2148_s13  ;;  %s75_s30 = sadd.s32 1, %s2140_s11 }
  0x11   : > { %p1931_p10 = pnand %p1930_p9, %p2211_p1  ;;  %p36_p12 = scmp.ge.s32.totalorder %s34_s29, 2 }
  0x12   : > { %p82_p13 = scmp.ne.s32.totalorder %s2140_s11, %s2136_s10  ;;  %p83_p0 = scmp.eq.s32.totalorder %s2152_s14, 0 }
  0x13   : > { %1933 = dma.hbm_to_vmem [thread:$0]  (!%p1931_p10), %s145_s23, 16384, %s147_s26, [#allocation4], %s3026_s27, %s3026_s27, %s2156_s28  }
  0x14   : > { %s3269_s29 = smov (%p36_p12, %s34_s29), 0  ;;  %p2252_p3 = por %p83_p0, %p82_p13 }
  0x15   : > { %p2258_p5 = por %p2215_p2, %p82_p13  ;;  %s71_s5 = ssub.s32 %s2148_s13, %s3269_s29 }
  0x16   : > { %p1943_p7 = scmp.lt.s32.totalorder %s2152_s14, 2  ;;  %p73_p9 = scmp.eq.s32.totalorder %s71_s5, 0 }
  0x17   : > { %s160_s6 = sand.u32 1, %s2140_s11   ;;  %s1920_s15 = sshll.u32 %s2148_s13, 4 }
  0x18   : > { %s1908_s7 = sshll.u32 %s160_s6, 10  ;;  %s172_s22 = scalar_lea.hbm %s3024_s1, %s1920_s15 }
  0x19   : > { %s2267_s8 = scalar_select %p73_p9, %s2140_s11, %s75_s30  }
  0x1a   : > { %s164_s23 = scalar_lea.vmem [#allocation6], %s1908_s7  ;;  %s173_s18 = sshll.u32 %s172_s22, 4  ;;  %s174_s18 = int_to_ptr.hbm [resolvable:$true] %s173_s18 }
  0x1b   : > { %s175_s25 = sshll.u32 %s164_s23, 4  ;;  %p1935_p2 = pnand %p1943_p7, %p2252_p3  ;;  %s176_s25 = int_to_ptr.vmem [resolvable:$true] %s175_s25 }
  0x1c   : > { %s161_s26 = scalar_lea.sflag [#allocation7], %s160_s6  ;;  %s2157_s28 = smov 256  }
  0x1d   : > { %s2158_s27 = smov 16   ;;  %s3110_s5 = smov 512  }
  0x1e   : > { %1937 = dma.hbm_to_vmem [thread:$0]  (!%p1935_p2), %s174_s18, 16384, %s176_s25, %s161_s26, %s3110_s5, %s2157_s28, %s2158_s27  }
  0x1f   : > { %187 = sbr.rel (%p2234_p8) target bundleno = 719 (0x2cf), region = 28 }
  0x24   : > { %2119 = dma.done.wait (%p2211_p1), [#allocation4], 16384  }
  0x25   : > { %2121 = vsyncadd (%p2211_p1), [#allocation4], 4294950912  ;;  %s2283_s30 = sand.u32 1, %s2136_s10  }
  0x26   : > { %s1913_s3 = sshll.u32 %s2283_s30, 10  ;;  %s195_s6 = scalar_lea.sflag [#allocation7], %s2283_s30 }
  0x27   : > { %s2287_s7 = scalar_lea.vmem [#allocation6], %s1913_s3 }
  0x28   : > { %2123 = dma.done.wait (%p2221_p4), %s195_s6, 16384  }
  0x29   : > { %2125 = vsyncadd (%p2221_p4), %s195_s6, 4294950912  ;;  %v580_v0 = vld [vmem:[%s2287_s7 + $0x2f0] sm:$0xff]  ;;  %v578_v1 = vld [vmem:[%s2287_s7 + $0x2e0] sm:$0xff]  ;;  %s1914_s17 = sshll.u32 %s2283_s30, 9  ;;  %s1921_s24 = sshll.u32 %s2144_s12, 4 }
  0x2a   : > { %v612_v2 = vld [vmem:[%s2287_s7 + $0x3f0] sm:$0xff]  ;;  %840 = vmatpush.msra.mxu2 %v580_v0  ;;  %v610_v6 = vld [vmem:[%s2287_s7 + $0x3e0] sm:$0xff]  ;;  %v361_v63 = vld [vmem:[#allocation3 + $0x18] sm:$0xff]  ;;  %s2598_s19 = scalar_lea.vmem [#allocation8], %s1914_s17  ;;  %s1792_s16 = scalar_lea.hbm %s3025_s2, %s1921_s24 }
  0x2b   : > { %953 = vmatpush.msra.mxu3 %v612_v2  ;;  %v516_v3 = vld [vmem:[%s2287_s7 + $0xf0] sm:$0xff]  ;;  %v514_v7 = vld [vmem:[%s2287_s7 + $0xe0] sm:$0xff]  ;;  %v581_v0 = vld [vmem:[%s2287_s7 + $0x2f8] sm:$0xff]  ;;  %s1793_s21 = sshll.u32 %s2598_s19, 4  ;;  %s1795_s22 = sshll.u32 %s1792_s16, 4  ;;  %s1794_s21 = int_to_ptr.vmem [resolvable:$true] %s1793_s21  ;;  %s1796_s22 = int_to_ptr.hbm [resolvable:$true] %s1795_s22 }
  0x2c   : > { %v548_v4 = vld [vmem:[%s2287_s7 + $0x1f0] sm:$0xff]  ;;  %614 = vmatpush.msra.mxu0 %v516_v3  ;;  %v546_v8 = vld [vmem:[%s2287_s7 + $0x1e0] sm:$0xff]  ;;  %841 = vmatpush.msra.mxu2 %v578_v1  ;;  %v613_v1 = vld [vmem:[%s2287_s7 + $0x3f8] sm:$0xff]  ;;  %s1778_s12 = scalar_lea.sflag [#allocation5], %s2283_s30  ;;  %s2080_s23 = sshra.s32 %s1796_s22, 4  ;;  %s2081_s23 = int_to_ptr.hbm [resolvable:$true] %s2080_s23 }
  0x2d   : > { %v576_v5 = vld [vmem:[%s2287_s7 + $0x2d0] sm:$0xff]  ;;  %727 = vmatpush.msra.mxu1 %v548_v4  ;;  %954 = vmatpush.msra.mxu3 %v610_v6  ;;  %v574_v11 = vld [vmem:[%s2287_s7 + $0x2c0] sm:$0xff]  ;;  %v517_v6 = vld [vmem:[%s2287_s7 + $0xf8] sm:$0xff]  ;;  %s2082_s25 = scalar_lea.hbm %s2081_s23, 512  ;;  %s2086_s28 = scalar_lea.hbm %s3025_s2, 1024 }
  0x2e   : > { %v608_v9 = vld [vmem:[%s2287_s7 + $0x3d0] sm:$0xff]  ;;  %615 = vmatpush.msra.mxu0 %v514_v7  ;;  %v606_v13 = vld [vmem:[%s2287_s7 + $0x3c0] sm:$0xff]  ;;  %842 = vmatpush.msra.mxu2 %v576_v5  ;;  %v359_v5 = vld [vmem:[#allocation3 + $0x8] sm:$0xff]  ;;  %p2083_p1 = scmp.ne.s32.totalorder %s2081_s23, %s2082_s25  ;;  %p2087_p10 = scmp.lt.s32.totalorder %s2081_s23, %s3025_s2 }
  0x2f   : > { %v512_v10 = vld [vmem:[%s2287_s7 + $0xd0] sm:$0xff]  ;;  %728 = vmatpush.msra.mxu1 %v546_v8  ;;  %955 = vmatpush.msra.mxu3 %v608_v9  ;;  %v510_v14 = vld [vmem:[%s2287_s7 + $0xc0] sm:$0xff]  ;;  %v549_v7 = vld [vmem:[%s2287_s7 + $0x1f8] sm:$0xff]  ;;  %p2088_p12 = scmp.lt.s32.totalorder %s2086_s28, %s2082_s25 }
  0x30   : > { %v544_v12 = vld [vmem:[%s2287_s7 + $0x1d0] sm:$0xff]  ;;  %v542_v15 = vld [vmem:[%s2287_s7 + $0x1c0] sm:$0xff]  ;;  %616 = vmatpush.msra.mxu0 %v512_v10  ;;  %843 = vmatpush.msra.mxu2 %v574_v11  ;;  %v579_v8 = vld [vmem:[%s2287_s7 + $0x2e8] sm:$0xff]  ;;  %p2084_p4 = pnand %p2083_p1, %p2258_p5 }
  0x31   : > { %729 = vmatpush.msra.mxu1 %v544_v12  ;;  %v572_v16 = vld [vmem:[%s2287_s7 + $0x2b0] sm:$0xff]  ;;  %956 = vmatpush.msra.mxu3 %v606_v13  ;;  %v570_v20 = vld [vmem:[%s2287_s7 + $0x2a0] sm:$0xff]  ;;  %v611_v9 = vld [vmem:[%s2287_s7 + $0x3e8] sm:$0xff]  ;;  %p2089_p13 = por %p2088_p12, %p2087_p10 }
  0x32   : > { %v604_v17 = vld [vmem:[%s2287_s7 + $0x3b0] sm:$0xff]  ;;  %617 = vmatpush.msra.mxu0 %v510_v14  ;;  %v602_v21 = vld [vmem:[%s2287_s7 + $0x3a0] sm:$0xff]  ;;  %844 = vmatpush.msra.mxu2 %v572_v16  ;;  %v515_v10 = vld [vmem:[%s2287_s7 + $0xe8] sm:$0xff]  ;;  %p2085_p8 = pneg %p2084_p4 }
  0x33   : > { %v508_v18 = vld [vmem:[%s2287_s7 + $0xb0] sm:$0xff]  ;;  %730 = vmatpush.msra.mxu1 %v542_v15  ;;  %957 = vmatpush.msra.mxu3 %v604_v17  ;;  %v506_v22 = vld [vmem:[%s2287_s7 + $0xa0] sm:$0xff]  ;;  %v547_v11 = vld [vmem:[%s2287_s7 + $0x1e8] sm:$0xff] }
  0x34   : > { %v540_v19 = vld [vmem:[%s2287_s7 + $0x1b0] sm:$0xff]  ;;  %v538_v23 = vld [vmem:[%s2287_s7 + $0x1a0] sm:$0xff]  ;;  %618 = vmatpush.msra.mxu0 %v508_v18  ;;  %845 = vmatpush.msra.mxu2 %v570_v20  ;;  %v577_v12 = vld [vmem:[%s2287_s7 + $0x2d8] sm:$0xff]  ;;  %p2090_p0 = pnand %p2089_p13, %p2085_p8 }
  0x35   : > { %731 = vmatpush.msra.mxu1 %v540_v19  ;;  %v568_v24 = vld [vmem:[%s2287_s7 + $0x290] sm:$0xff]  ;;  %958 = vmatpush.msra.mxu3 %v602_v21  ;;  %v566_v28 = vld [vmem:[%s2287_s7 + $0x280] sm:$0xff]  ;;  %v609_v13 = vld [vmem:[%s2287_s7 + $0x3d8] sm:$0xff] }
  0x36   : > { %v600_v25 = vld [vmem:[%s2287_s7 + $0x390] sm:$0xff]  ;;  %619 = vmatpush.msra.mxu0 %v506_v22  ;;  %v598_v29 = vld [vmem:[%s2287_s7 + $0x380] sm:$0xff]  ;;  %846 = vmatpush.msra.mxu2 %v568_v24  ;;  %v2369_v15 = vld [vmem:[#allocation3 + $0x38] sm:$0xff] }
  0x37   : > { %v504_v26 = vld [vmem:[%s2287_s7 + $0x90] sm:$0xff]  ;;  %732 = vmatpush.msra.mxu1 %v538_v23  ;;  %959 = vmatpush.msra.mxu3 %v600_v25  ;;  %v502_v30 = vld [vmem:[%s2287_s7 + $0x80] sm:$0xff]  ;;  %v513_v16 = vld [vmem:[%s2287_s7 + $0xd8] sm:$0xff] }
  0x38   : > { %v536_v27 = vld [vmem:[%s2287_s7 + $0x190] sm:$0xff]  ;;  %v534_v31 = vld [vmem:[%s2287_s7 + $0x180] sm:$0xff]  ;;  %620 = vmatpush.msra.mxu0 %v504_v26  ;;  %847 = vmatpush.msra.mxu2 %v566_v28  ;;  %v545_v17 = vld [vmem:[%s2287_s7 + $0x1d8] sm:$0xff] }
  0x39   : > { %733 = vmatpush.msra.mxu1 %v536_v27  ;;  %v564_v32 = vld [vmem:[%s2287_s7 + $0x270] sm:$0xff]  ;;  %960 = vmatpush.msra.mxu3 %v598_v29  ;;  %v562_v36 = vld [vmem:[%s2287_s7 + $0x260] sm:$0xff]  ;;  %v2377_v19 = vld [vmem:[#allocation3 + $0x28] sm:$0xff] }
  0x3a   : > { %v596_v33 = vld [vmem:[%s2287_s7 + $0x370] sm:$0xff]  ;;  %621 = vmatpush.msra.mxu0 %v502_v30  ;;  %v594_v37 = vld [vmem:[%s2287_s7 + $0x360] sm:$0xff]  ;;  %848 = vmatpush.msra.mxu2 %v564_v32  ;;  %v2383_v21 = vld [vmem:[#allocation3 + $0x58] sm:$0xff] }
  0x3b   : > { %v500_v34 = vld [vmem:[%s2287_s7 + $0x70] sm:$0xff]  ;;  %734 = vmatpush.msra.mxu1 %v534_v31  ;;  %961 = vmatpush.msra.mxu3 %v596_v33  ;;  %v498_v38 = vld [vmem:[%s2287_s7 + $0x60] sm:$0xff]  ;;  %v2389_v23 = vld [vmem:[#allocation3 + $0x48] sm:$0xff] }
  0x3c   : > { %v532_v35 = vld [vmem:[%s2287_s7 + $0x170] sm:$0xff]  ;;  %v530_v39 = vld [vmem:[%s2287_s7 + $0x160] sm:$0xff]  ;;  %622 = vmatpush.msra.mxu0 %v500_v34  ;;  %849 = vmatpush.msra.mxu2 %v562_v36  ;;  %v575_v24 = vld [vmem:[%s2287_s7 + $0x2c8] sm:$0xff] }
  0x3d   : > { %735 = vmatpush.msra.mxu1 %v532_v35  ;;  %v560_v40 = vld [vmem:[%s2287_s7 + $0x250] sm:$0xff]  ;;  %962 = vmatpush.msra.mxu3 %v594_v37  ;;  %v558_v44 = vld [vmem:[%s2287_s7 + $0x240] sm:$0xff]  ;;  %v607_v25 = vld [vmem:[%s2287_s7 + $0x3c8] sm:$0xff] }
  0x3e   : > { %v592_v41 = vld [vmem:[%s2287_s7 + $0x350] sm:$0xff]  ;;  %623 = vmatpush.msra.mxu0 %v498_v38  ;;  %v590_v45 = vld [vmem:[%s2287_s7 + $0x340] sm:$0xff]  ;;  %850 = vmatpush.msra.mxu2 %v560_v40  ;;  %v511_v26 = vld [vmem:[%s2287_s7 + $0xc8] sm:$0xff] }
  0x3f   : > { %v496_v42 = vld [vmem:[%s2287_s7 + $0x50] sm:$0xff]  ;;  %736 = vmatpush.msra.mxu1 %v530_v39  ;;  %963 = vmatpush.msra.mxu3 %v592_v41  ;;  %v494_v46 = vld [vmem:[%s2287_s7 + $0x40] sm:$0xff]  ;;  %v543_v27 = vld [vmem:[%s2287_s7 + $0x1c8] sm:$0xff] }
  0x40   : > { %v528_v43 = vld [vmem:[%s2287_s7 + $0x150] sm:$0xff]  ;;  %v526_v47 = vld [vmem:[%s2287_s7 + $0x140] sm:$0xff]  ;;  %624 = vmatpush.msra.mxu0 %v496_v42  ;;  %851 = vmatpush.msra.mxu2 %v558_v44  ;;  %v2399_v29 = vld [vmem:[#allocation3 + $0x78] sm:$0xff] }
  0x41   : > { %737 = vmatpush.msra.mxu1 %v528_v43  ;;  %v556_v48 = vld [vmem:[%s2287_s7 + $0x230] sm:$0xff]  ;;  %964 = vmatpush.msra.mxu3 %v590_v45  ;;  %v554_v52 = vld [vmem:[%s2287_s7 + $0x220] sm:$0xff]  ;;  %v2405_v31 = vld [vmem:[#allocation3 + $0x68] sm:$0xff] }
  0x42   : > { %v588_v49 = vld [vmem:[%s2287_s7 + $0x330] sm:$0xff]  ;;  %625 = vmatpush.msra.mxu0 %v494_v46  ;;  %v586_v53 = vld [vmem:[%s2287_s7 + $0x320] sm:$0xff]  ;;  %852 = vmatpush.msra.mxu2 %v556_v48  ;;  %v2411_v33 = vld [vmem:[#allocation3 + $0x98] sm:$0xff] }
  0x43   : > { %v492_v50 = vld [vmem:[%s2287_s7 + $0x30] sm:$0xff]  ;;  %738 = vmatpush.msra.mxu1 %v526_v47  ;;  %965 = vmatpush.msra.mxu3 %v588_v49  ;;  %v490_v54 = vld [vmem:[%s2287_s7 + $0x20] sm:$0xff]  ;;  %v2417_v35 = vld [vmem:[#allocation3 + $0x88] sm:$0xff] }
  0x44   : > { %v524_v51 = vld [vmem:[%s2287_s7 + $0x130] sm:$0xff]  ;;  %v522_v55 = vld [vmem:[%s2287_s7 + $0x120] sm:$0xff]  ;;  %626 = vmatpush.msra.mxu0 %v492_v50  ;;  %853 = vmatpush.msra.mxu2 %v554_v52  ;;  %v573_v36 = vld [vmem:[%s2287_s7 + $0x2b8] sm:$0xff] }
  0x45   : > { %739 = vmatpush.msra.mxu1 %v524_v51  ;;  %v552_v56 = vld [vmem:[%s2287_s7 + $0x210] sm:$0xff]  ;;  %966 = vmatpush.msra.mxu3 %v586_v53  ;;  %v550_v60 = vld [vmem:[%s2287_s7 + $0x200] sm:$0xff]  ;;  %v605_v37 = vld [vmem:[%s2287_s7 + $0x3b8] sm:$0xff] }
  0x46   : > { %v584_v57 = vld [vmem:[%s2287_s7 + $0x310] sm:$0xff]  ;;  %627 = vmatpush.msra.mxu0 %v490_v54  ;;  %v582_v61 = vld [vmem:[%s2287_s7 + $0x300] sm:$0xff]  ;;  %854 = vmatpush.msra.mxu2 %v552_v56  ;;  %v509_v38 = vld [vmem:[%s2287_s7 + $0xb8] sm:$0xff] }
  0x47   : > { %v488_v58 = vld [vmem:[%s2287_s7 + $0x10] sm:$0xff]  ;;  %740 = vmatpush.msra.mxu1 %v522_v55  ;;  %967 = vmatpush.msra.mxu3 %v584_v57  ;;  %v486_v2 = vld [vmem:[%s2287_s7] sm:$0xff]  ;;  %v541_v39 = vld [vmem:[%s2287_s7 + $0x1b8] sm:$0xff] }
  0x48   : > { %v520_v59 = vld [vmem:[%s2287_s7 + $0x110] sm:$0xff]  ;;  %628 = vmatpush.msra.mxu0 %v488_v58  ;;  %855 = vmatpush.msra.mxu2 %v550_v60  ;;  %v518_v3 = vld [vmem:[%s2287_s7 + $0x100] sm:$0xff]  ;;  %v2427_v41 = vld [vmem:[#allocation3 + $0xb8] sm:$0xff] }
  0x49   : > { %v360_v62 = vld [vmem:[#allocation3 + $0x10] sm:$0xff]  ;;  %741 = vmatpush.msra.mxu1 %v520_v59  ;;  %968 = vmatpush.msra.mxu3 %v582_v61  ;;  %v358_v4 = vld [vmem:[#allocation3] sm:$0xff]  ;;  %v2433_v43 = vld [vmem:[#allocation3 + $0xa8] sm:$0xff] }
  0x4a   : > { %856 = vmatmul.f32.vlgmr.msra.gmra.mxu2 %v360_v62  ;;  %969 = vmatmul.f32.vlgmr.msra.gmra.mxu3 %v361_v63  ;;  %v2367_v14 = vld [vmem:[#allocation3 + $0x30] sm:$0xff]  ;;  %v2375_v18 = vld [vmem:[#allocation3 + $0x20] sm:$0xff]  ;;  %v2439_v45 = vld [vmem:[#allocation3 + $0xd8] sm:$0xff] }
  0x4b   : > { %1292 = vmatpush.msrb.mxu2 %v581_v0  ;;  %1405 = vmatpush.msrb.mxu3 %v613_v1  ;;  %v2381_v20 = vld [vmem:[#allocation3 + $0x50] sm:$0xff]  ;;  %v2385_v22 = vld [vmem:[#allocation3 + $0x40] sm:$0xff]  ;;  %v2445_v47 = vld [vmem:[#allocation3 + $0xc8] sm:$0xff] }
  0x4c   : > { %629 = vmatpush.msra.mxu0 %v486_v2  ;;  %742 = vmatpush.msra.mxu1 %v518_v3  ;;  %v2397_v28 = vld [vmem:[#allocation3 + $0x70] sm:$0xff]  ;;  %v2403_v30 = vld [vmem:[#allocation3 + $0x60] sm:$0xff]  ;;  %v571_v48 = vld [vmem:[%s2287_s7 + $0x2a8] sm:$0xff] }
  0x4d   : > { %630 = vmatmul.f32.vlgmr.msra.gmra.mxu0 %v358_v4  ;;  %743 = vmatmul.f32.vlgmr.msra.gmra.mxu1 %v359_v5  ;;  %v2409_v32 = vld [vmem:[#allocation3 + $0x90] sm:$0xff]  ;;  %v2413_v34 = vld [vmem:[#allocation3 + $0x80] sm:$0xff]  ;;  %v603_v49 = vld [vmem:[%s2287_s7 + $0x3a8] sm:$0xff] }
  0x4e   : > { %1066 = vmatpush.msrb.mxu0 %v517_v6  ;;  %1179 = vmatpush.msrb.mxu1 %v549_v7  ;;  %v2425_v40 = vld [vmem:[#allocation3 + $0xb0] sm:$0xff]  ;;  %v2431_v42 = vld [vmem:[#allocation3 + $0xa0] sm:$0xff]  ;;  %v507_v50 = vld [vmem:[%s2287_s7 + $0xa8] sm:$0xff] }
  0x4f   : > { %1293 = vmatpush.msrb.mxu2 %v579_v8  ;;  %1406 = vmatpush.msrb.mxu3 %v611_v9  ;;  %v2437_v44 = vld [vmem:[#allocation3 + $0xd0] sm:$0xff]  ;;  %v2441_v46 = vld [vmem:[#allocation3 + $0xc0] sm:$0xff]  ;;  %v539_v51 = vld [vmem:[%s2287_s7 + $0x1a8] sm:$0xff] }
  0x50   : > { %1067 = vmatpush.msrb.mxu0 %v515_v10  ;;  %1180 = vmatpush.msrb.mxu1 %v547_v11  ;;  %v2453_v52 = vld [vmem:[#allocation3 + $0xf0] sm:$0xff]  ;;  %v2455_v53 = vld [vmem:[#allocation3 + $0xf8] sm:$0xff]  ;;  %v2459_v54 = vld [vmem:[#allocation3 + $0xe0] sm:$0xff] }
  0x51   : > { %1294 = vmatpush.msrb.mxu2 %v577_v12  ;;  %1407 = vmatpush.msrb.mxu3 %v609_v13  ;;  %v2461_v55 = vld [vmem:[#allocation3 + $0xe8] sm:$0xff]  ;;  %v2465_v56 = vld [vmem:[#allocation3 + $0x110] sm:$0xff]  ;;  %v2467_v57 = vld [vmem:[#allocation3 + $0x118] sm:$0xff] }
  0x52   : > { %859 = vmatmul.f32.gmra.mxu2 %v2367_v14  ;;  %972 = vmatmul.f32.gmra.mxu3 %v2369_v15  ;;  %v2469_v58 = vld [vmem:[#allocation3 + $0x100] sm:$0xff]  ;;  %v2473_v59 = vld [vmem:[#allocation3 + $0x108] sm:$0xff]  ;;  %v569_v60 = vld [vmem:[%s2287_s7 + $0x298] sm:$0xff] }
  0x53   : > { %1068 = vmatpush.msrb.mxu0 %v513_v16  ;;  %1181 = vmatpush.msrb.mxu1 %v545_v17  ;;  %v601_v61 = vld [vmem:[%s2287_s7 + $0x398] sm:$0xff]  ;;  %v2481_v0 = vld [vmem:[#allocation3 + $0x130] sm:$0xff]  ;;  %v2487_v2 = vld [vmem:[#allocation3 + $0x120] sm:$0xff] }
  0x54   : > { %1295 = vmatpush.msrb.mxu2 %v575_v24  ;;  %1408 = vmatpush.msrb.mxu3 %v607_v25  ;;  %v505_v62 = vld [vmem:[%s2287_s7 + $0x98] sm:$0xff]  ;;  %v2489_v3 = vld [vmem:[#allocation3 + $0x128] sm:$0xff]  ;;  %v2493_v4 = vld [vmem:[#allocation3 + $0x150] sm:$0xff] }
  0x55   : > { %633 = vmatmul.f32.gmra.mxu0 %v2375_v18  ;;  %746 = vmatmul.f32.gmra.mxu1 %v2377_v19  ;;  %v537_v63 = vld [vmem:[%s2287_s7 + $0x198] sm:$0xff]  ;;  %v2497_v6 = vld [vmem:[#allocation3 + $0x140] sm:$0xff]  ;;  %v2501_v7 = vld [vmem:[#allocation3 + $0x148] sm:$0xff] }
  0x56   : > { %1069 = vmatpush.msrb.mxu0 %v511_v26  ;;  %1182 = vmatpush.msrb.mxu1 %v543_v27  ;;  %v2483_v1 = vld [vmem:[#allocation3 + $0x138] sm:$0xff]  ;;  %v567_v8 = vld [vmem:[%s2287_s7 + $0x288] sm:$0xff]  ;;  %v2509_v12 = vld [vmem:[#allocation3 + $0x170] sm:$0xff] }
  0x57   : > { %1296 = vmatpush.msrb.mxu2 %v573_v36  ;;  %1409 = vmatpush.msrb.mxu3 %v605_v37  ;;  %v2495_v5 = vld [vmem:[#allocation3 + $0x158] sm:$0xff]  ;;  %v599_v9 = vld [vmem:[%s2287_s7 + $0x388] sm:$0xff]  ;;  %v2515_v16 = vld [vmem:[#allocation3 + $0x160] sm:$0xff] }
  0x58   : > { %1070 = vmatpush.msrb.mxu0 %v509_v38  ;;  %1183 = vmatpush.msrb.mxu1 %v541_v39  ;;  %v503_v10 = vld [vmem:[%s2287_s7 + $0x88] sm:$0xff]  ;;  %v2511_v13 = vld [vmem:[#allocation3 + $0x178] sm:$0xff]  ;;  %v2521_v24 = vld [vmem:[#allocation3 + $0x190] sm:$0xff] }
  0x59   : > { %1297 = vmatpush.msrb.mxu2 %v571_v48  ;;  %1410 = vmatpush.msrb.mxu3 %v603_v49  ;;  %v535_v11 = vld [vmem:[%s2287_s7 + $0x188] sm:$0xff]  ;;  %v2523_v25 = vld [vmem:[#allocation3 + $0x198] sm:$0xff]  ;;  %v2527_v26 = vld [vmem:[#allocation3 + $0x180] sm:$0xff] }
  0x5a   : > { %862 = vmatmul.f32.gmra.mxu2 %v2381_v20  ;;  %975 = vmatmul.f32.gmra.mxu3 %v2383_v21  ;;  %v2517_v17 = vld [vmem:[#allocation3 + $0x168] sm:$0xff]  ;;  %v565_v36 = vld [vmem:[%s2287_s7 + $0x278] sm:$0xff]  ;;  %v2537_v48 = vld [vmem:[#allocation3 + $0x1b0] sm:$0xff] }
  0x5b   : > { %1071 = vmatpush.msrb.mxu0 %v507_v50  ;;  %1184 = vmatpush.msrb.mxu1 %v539_v51  ;;  %v2529_v27 = vld [vmem:[#allocation3 + $0x188] sm:$0xff]  ;;  %v597_v37 = vld [vmem:[%s2287_s7 + $0x378] sm:$0xff]  ;;  %3111 = vst [vmem:[#allocation12_spill] sm:$0xff] %v2537_v48  ;;  %v2543_v50 = vld [vmem:[#allocation3 + $0x1a0] sm:$0xff] }
  0x5c   : > { %1298 = vmatpush.msrb.mxu2 %v569_v60  ;;  %1411 = vmatpush.msrb.mxu3 %v601_v61  ;;  %v501_v38 = vld [vmem:[%s2287_s7 + $0x78] sm:$0xff]  ;;  %3113 = vst [vmem:[#allocation14_spill] sm:$0xff] %v2543_v50  ;;  %v2545_v51 = vld [vmem:[#allocation3 + $0x1a8] sm:$0xff]  ;;  %v2549_v60 = vld [vmem:[#allocation3 + $0x1d0] sm:$0xff] }
  0x5d   : > { %636 = vmatmul.f32.gmra.mxu0 %v2385_v22  ;;  %749 = vmatmul.f32.gmra.mxu1 %v2389_v23  ;;  %v533_v39 = vld [vmem:[%s2287_s7 + $0x178] sm:$0xff]  ;;  %3114 = vst [vmem:[#allocation15_spill] sm:$0xff] %v2545_v51 }
  0x5e   : > { %1072 = vmatpush.msrb.mxu0 %v505_v62  ;;  %1185 = vmatpush.msrb.mxu1 %v537_v63  ;;  %v2539_v49 = vld [vmem:[#allocation3 + $0x1b8] sm:$0xff]  ;;  %3115 = vst [vmem:[#allocation16_spill] sm:$0xff] %v2549_v60  ;;  %v2555_v62 = vld [vmem:[#allocation3 + $0x1c0] sm:$0xff]  ;;  %v2557_v63 = vld [vmem:[#allocation3 + $0x1c8] sm:$0xff] }
  0x5f   : > { %1299 = vmatpush.msrb.mxu2 %v567_v8  ;;  %1412 = vmatpush.msrb.mxu3 %v599_v9  ;;  %3112 = vst [vmem:[#allocation13_spill] sm:$0xff] %v2539_v49  ;;  %v2551_v61 = vld [vmem:[#allocation3 + $0x1d8] sm:$0xff]  ;;  %v563_v8 = vld [vmem:[%s2287_s7 + $0x268] sm:$0xff] }
  0x60   : > { %1073 = vmatpush.msrb.mxu0 %v503_v10  ;;  %1186 = vmatpush.msrb.mxu1 %v535_v11  ;;  %3116 = vst [vmem:[#allocation17_spill] sm:$0xff] %v2551_v61  ;;  %v595_v9 = vld [vmem:[%s2287_s7 + $0x368] sm:$0xff] }
  0x61   : > { %1300 = vmatpush.msrb.mxu2 %v565_v36  ;;  %1413 = vmatpush.msrb.mxu3 %v597_v37  ;;  %3117 = vst [vmem:[#allocation18_spill] sm:$0xff] %v2555_v62  ;;  %v499_v10 = vld [vmem:[%s2287_s7 + $0x68] sm:$0xff]  ;;  %v2565_v36 = vld [vmem:[#allocation3 + $0x1f0] sm:$0xff]  ;;  %v2567_v37 = vld [vmem:[#allocation3 + $0x1f8] sm:$0xff] }
  0x62   : > { %865 = vmatmul.f32.gmra.mxu2 %v2397_v28  ;;  %978 = vmatmul.f32.gmra.mxu3 %v2399_v29  ;;  %3118 = vst [vmem:[#allocation19_spill] sm:$0xff] %v2557_v63  ;;  %v531_v11 = vld [vmem:[%s2287_s7 + $0x168] sm:$0xff] }
  0x63   : > { %1074 = vmatpush.msrb.mxu0 %v501_v38  ;;  %1187 = vmatpush.msrb.mxu1 %v533_v39  ;;  %3119 = vst [vmem:[#allocation20_spill] sm:$0xff] %v2565_v36  ;;  %v2571_v38 = vld [vmem:[#allocation3 + $0x1e0] sm:$0xff]  ;;  %v2573_v39 = vld [vmem:[#allocation3 + $0x1e8] sm:$0xff] }
  0x64   : > { %1301 = vmatpush.msrb.mxu2 %v563_v8  ;;  %1414 = vmatpush.msrb.mxu3 %v595_v9  ;;  %3120 = vst [vmem:[#allocation21_spill] sm:$0xff] %v2567_v37  ;;  %v2577_v8 = vld [vmem:[#allocation3 + $0x210] sm:$0xff]  ;;  %v2579_v9 = vld [vmem:[#allocation3 + $0x218] sm:$0xff] }
  0x65   : > { %639 = vmatmul.f32.gmra.mxu0 %v2403_v30  ;;  %752 = vmatmul.f32.gmra.mxu1 %v2405_v31  ;;  %3121 = vst [vmem:[#allocation22_spill] sm:$0xff] %v2571_v38 }
  0x66   : > { %1075 = vmatpush.msrb.mxu0 %v499_v10  ;;  %1188 = vmatpush.msrb.mxu1 %v531_v11  ;;  %3122 = vst [vmem:[#allocation23_spill] sm:$0xff] %v2573_v39 }
  0x67   : > { %3123 = vst [vmem:[#allocation24_spill] sm:$0xff] %v2577_v8 }
  0x68   : > { %3124 = vst [vmem:[#allocation25_spill] sm:$0xff] %v2579_v9 }
  0x6a   : > { %868 = vmatmul.f32.gmra.mxu2 %v2409_v32  ;;  %981 = vmatmul.f32.gmra.mxu3 %v2411_v33 }
  0x6d   : > { %642 = vmatmul.f32.gmra.mxu0 %v2413_v34  ;;  %755 = vmatmul.f32.gmra.mxu1 %v2417_v35 }
  0x72   : > { %871 = vmatmul.f32.gmra.mxu2 %v2425_v40  ;;  %984 = vmatmul.f32.gmra.mxu3 %v2427_v41 }
  0x75   : > { %645 = vmatmul.f32.gmra.mxu0 %v2431_v42  ;;  %758 = vmatmul.f32.gmra.mxu1 %v2433_v43 }
  0x7a   : > { %874 = vmatmul.f32.gmra.mxu2 %v2437_v44  ;;  %987 = vmatmul.f32.gmra.mxu3 %v2439_v45 }
  0x7d   : > { %648 = vmatmul.f32.gmra.mxu0 %v2441_v46  ;;  %761 = vmatmul.f32.gmra.mxu1 %v2445_v47 }
  0x82   : > { %877 = vmatmul.f32.gmra.mxu2 %v2453_v52  ;;  %990 = vmatmul.f32.gmra.mxu3 %v2455_v53 }
  0x85   : > { %651 = vmatmul.f32.gmra.mxu0 %v2459_v54  ;;  %764 = vmatmul.f32.gmra.mxu1 %v2461_v55 }
  0x8a   : > { %880 = vmatmul.f32.gmra.mxu2 %v2465_v56  ;;  %993 = vmatmul.f32.gmra.mxu3 %v2467_v57 }
  0x8d   : > { %654 = vmatmul.f32.gmra.mxu0 %v2469_v58  ;;  %767 = vmatmul.f32.gmra.mxu1 %v2473_v59 }
  0x92   : > { %883 = vmatmul.f32.gmra.mxu2 %v2481_v0  ;;  %996 = vmatmul.f32.gmra.mxu3 %v2483_v1 }
  0x95   : > { %657 = vmatmul.f32.gmra.mxu0 %v2487_v2  ;;  %770 = vmatmul.f32.gmra.mxu1 %v2489_v3 }
  0x9a   : > { %886 = vmatmul.f32.gmra.mxu2 %v2493_v4  ;;  %999 = vmatmul.f32.gmra.mxu3 %v2495_v5 }
  0x9d   : > { %660 = vmatmul.f32.gmra.mxu0 %v2497_v6  ;;  %773 = vmatmul.f32.gmra.mxu1 %v2501_v7 }
  0xa2   : > { %889 = vmatmul.f32.gmra.mxu2 %v2509_v12  ;;  %1002 = vmatmul.f32.gmra.mxu3 %v2511_v13 }
  0xa5   : > { %663 = vmatmul.f32.gmra.mxu0 %v2515_v16  ;;  %776 = vmatmul.f32.gmra.mxu1 %v2517_v17 }
  0xaa   : > { %892 = vmatmul.f32.gmra.mxu2 %v2521_v24  ;;  %1005 = vmatmul.f32.gmra.mxu3 %v2523_v25 }
  0xad   : > { %666 = vmatmul.f32.gmra.mxu0 %v2527_v26  ;;  %779 = vmatmul.f32.gmra.mxu1 %v2529_v27 }
  0xb2   : > { %895 = vmatmul.f32.gmra.mxu2 %v2537_v48  ;;  %1008 = vmatmul.f32.gmra.mxu3 %v2539_v49  ;;  %v2004_v48 = vld [vmem:[#allocation3] sm:$0xff] }
  0xb5   : > { %669 = vmatmul.f32.gmra.mxu0 %v2543_v50  ;;  %782 = vmatmul.f32.gmra.mxu1 %v2545_v51  ;;  %v529_v51 = vld [vmem:[%s2287_s7 + $0x158] sm:$0xff] }
  0xb6   : > { %v2596_v50 = vld [vmem:[#allocation3 + $0x238] sm:$0xff]  ;;  %1189 = vmatpush.msrb.mxu1 %v529_v51 }
  0xb7   : > { %3128 = vst [vmem:[#allocation29_spill] sm:$0xff] %v2596_v50 }
  0xba   : > { %898 = vmatmul.f32.gmra.mxu2 %v2549_v60  ;;  %1011 = vmatmul.f32.gmra.mxu3 %v2551_v61  ;;  %v497_v60 = vld [vmem:[%s2287_s7 + $0x58] sm:$0xff] }
  0xbb   : > { %1076 = vmatpush.msrb.mxu0 %v497_v60 }
  0xbd   : > { %672 = vmatmul.f32.gmra.mxu0 %v2555_v62  ;;  %785 = vmatmul.f32.gmra.mxu1 %v2557_v63  ;;  %v561_v63 = vld [vmem:[%s2287_s7 + $0x258] sm:$0xff] }
  0xbe   : > { %1302 = vmatpush.msrb.mxu2 %v561_v63 }
  0xc2   : > { %901 = vmatmul.f32.gmra.mxu2 %v2565_v36  ;;  %1014 = vmatmul.f32.gmra.mxu3 %v2567_v37  ;;  %v2583_v37 = vld [vmem:[#allocation3 + $0x200] sm:$0xff]  ;;  %v2585_v36 = vld [vmem:[#allocation3 + $0x208] sm:$0xff] }
  0xc3   : > { %3125 = vst [vmem:[#allocation26_spill] sm:$0xff] %v2583_v37 }
  0xc4   : > { %3126 = vst [vmem:[#allocation27_spill] sm:$0xff] %v2585_v36 }
  0xc5   : > { %675 = vmatmul.f32.gmra.mxu0 %v2571_v38  ;;  %788 = vmatmul.f32.gmra.mxu1 %v2573_v39  ;;  %v593_v39 = vld [vmem:[%s2287_s7 + $0x358] sm:$0xff] }
  0xc6   : > { %1415 = vmatpush.msrb.mxu3 %v593_v39 }
  0xca   : > { %904 = vmatmul.f32.gmra.mxu2 %v2577_v8  ;;  %v631_v10 = vpop.f32.mrf.mxu0  ;;  %v744_v11 = vpop.f32.mrf.mxu1  ;;  %1017 = vmatmul.f32.gmra.mxu3 %v2579_v9  ;;  %v2594_v9 = vld [vmem:[#allocation3 + $0x230] sm:$0xff] }
  0xcb   : > { %v745_v38 = vadd.f32 %v744_v11, %v631_v10  ;;  %3127 = vst [vmem:[#allocation28_spill] sm:$0xff] %v2594_v9 }
  0xcd   : > { %v857_v62 = vpop.f32.mrf.mxu2  ;;  %678 = vmatmul.f32.gmra.mxu0 %v2583_v37  ;;  %791 = vmatmul.f32.gmra.mxu1 %v2585_v36  ;;  %v970_v8 = vpop.f32.mrf.mxu3  ;;  %v527_v36 = vld [vmem:[%s2287_s7 + $0x148] sm:$0xff]  ;;  %v2628_v37 = vld [vmem:[#allocation3 + $0x278] sm:$0xff] }
  0xce   : > { %v858_v61 = vadd.f32 %v857_v62, %v745_v38  ;;  %v2603_v62 = vld [vmem:[#allocation3 + $0x220] sm:$0xff]  ;;  %v2605_v38 = vld [vmem:[#allocation3 + $0x228] sm:$0xff]  ;;  %3136 = vst [vmem:[#allocation37_spill] sm:$0xff] %v2628_v37  ;;  %1190 = vmatpush.msrb.mxu1 %v527_v36 }
  0xcf   : > { %3129 = vst [vmem:[#allocation30_spill] sm:$0xff] %v2603_v62 }
  0xd0   : > { %v971_v10 = vadd.f32 %v970_v8, %v858_v61  ;;  %3130 = vst [vmem:[#allocation31_spill] sm:$0xff] %v2605_v38  ;;  %v2609_v8 = vld [vmem:[#allocation3 + $0x250] sm:$0xff] }
  0xd1   : > { %3131 = vst [vmem:[#allocation32_spill] sm:$0xff] %v2609_v8 }
  0xd2   : > { %1713 = vst [vmem:[%s2598_s19] sm:$0xff] %v971_v10  ;;  %907 = vmatmul.f32.gmra.mxu2 %v2594_v9  ;;  %v634_v63 = vpop.f32.mrf.mxu0  ;;  %v747_v39 = vpop.f32.mrf.mxu1  ;;  %1020 = vmatmul.f32.gmra.mxu3 %v2596_v50  ;;  %v2611_v10 = vld [vmem:[#allocation3 + $0x258] sm:$0xff] }
  0xd3   : > { %v748_v11 = vadd.f32 %v747_v39, %v634_v63  ;;  %3132 = vst [vmem:[#allocation33_spill] sm:$0xff] %v2611_v10  ;;  %v2616_v39 = vld [vmem:[#allocation3 + $0x240] sm:$0xff] }
  0xd4   : > { %3133 = vst [vmem:[#allocation34_spill] sm:$0xff] %v2616_v39 }
  0xd5   : > { %v860_v60 = vpop.f32.mrf.mxu2  ;;  %681 = vmatmul.f32.gmra.mxu0 %v2603_v62  ;;  %794 = vmatmul.f32.gmra.mxu1 %v2605_v38  ;;  %v973_v51 = vpop.f32.mrf.mxu3  ;;  %v2618_v38 = vld [vmem:[#allocation3 + $0x248] sm:$0xff] }
  0xd6   : > { %v861_v61 = vadd.f32 %v860_v60, %v748_v11  ;;  %3134 = vst [vmem:[#allocation35_spill] sm:$0xff] %v2618_v38  ;;  %v559_v62 = vld [vmem:[%s2287_s7 + $0x248] sm:$0xff] }
  0xd7   : > { %1303 = vmatpush.msrb.mxu2 %v559_v62  ;;  %v591_v60 = vld [vmem:[%s2287_s7 + $0x348] sm:$0xff] }
  0xd8   : > { %v974_v9 = vadd.f32 %v973_v51, %v861_v61  ;;  %1416 = vmatpush.msrb.mxu3 %v591_v60  ;;  %v2633_v60 = vld [vmem:[#allocation3 + $0x260] sm:$0xff] }
  0xd9   : > { %3137 = vst [vmem:[#allocation38_spill] sm:$0xff] %v2633_v60 }
  0xda   : > { %1715 = vst [vmem:[%s2598_s19 + $0x10] sm:$0xff] %v974_v9  ;;  %910 = vmatmul.f32.gmra.mxu2 %v2609_v8  ;;  %v637_v50 = vpop.f32.mrf.mxu0  ;;  %v750_v63 = vpop.f32.mrf.mxu1  ;;  %1023 = vmatmul.f32.gmra.mxu3 %v2611_v10  ;;  %v495_v8 = vld [vmem:[%s2287_s7 + $0x48] sm:$0xff]  ;;  %v2626_v10 = vld [vmem:[#allocation3 + $0x270] sm:$0xff] }
  0xdb   : > { %v751_v11 = vadd.f32 %v750_v63, %v637_v50  ;;  %3135 = vst [vmem:[#allocation36_spill] sm:$0xff] %v2626_v10  ;;  %1077 = vmatpush.msrb.mxu0 %v495_v8 }
  0xdd   : > { %v863_v51 = vpop.f32.mrf.mxu2  ;;  %684 = vmatmul.f32.gmra.mxu0 %v2616_v39  ;;  %797 = vmatmul.f32.gmra.mxu1 %v2618_v38  ;;  %v976_v9 = vpop.f32.mrf.mxu3  ;;  %v2658_v39 = vld [vmem:[#allocation3 + $0x2b8] sm:$0xff] }
  0xde   : > { %v864_v61 = vadd.f32 %v863_v51, %v751_v11  ;;  %v2635_v11 = vld [vmem:[#allocation3 + $0x268] sm:$0xff]  ;;  %3144 = vst [vmem:[#allocation45_spill] sm:$0xff] %v2658_v39 }
  0xdf   : > { %3138 = vst [vmem:[#allocation39_spill] sm:$0xff] %v2635_v11 }
  0xe0   : > { %v977_v50 = vadd.f32 %v976_v9, %v864_v61  ;;  %v2639_v9 = vld [vmem:[#allocation3 + $0x290] sm:$0xff]  ;;  %v2641_v61 = vld [vmem:[#allocation3 + $0x298] sm:$0xff] }
  0xe1   : > { %3139 = vst [vmem:[#allocation40_spill] sm:$0xff] %v2639_v9 }
  0xe2   : > { %1717 = vst [vmem:[%s2598_s19 + $0x20] sm:$0xff] %v977_v50  ;;  %913 = vmatmul.f32.gmra.mxu2 %v2626_v10  ;;  %v640_v62 = vpop.f32.mrf.mxu0  ;;  %v753_v63 = vpop.f32.mrf.mxu1  ;;  %1026 = vmatmul.f32.gmra.mxu3 %v2628_v37  ;;  %v525_v10 = vld [vmem:[%s2287_s7 + $0x138] sm:$0xff] }
  0xe3   : > { %v754_v51 = vadd.f32 %v753_v63, %v640_v62  ;;  %3140 = vst [vmem:[#allocation41_spill] sm:$0xff] %v2641_v61  ;;  %v2646_v63 = vld [vmem:[#allocation3 + $0x280] sm:$0xff]  ;;  %1191 = vmatpush.msrb.mxu1 %v525_v10 }
  0xe4   : > { %3141 = vst [vmem:[#allocation42_spill] sm:$0xff] %v2646_v63 }
  0xe5   : > { %v866_v38 = vpop.f32.mrf.mxu2  ;;  %687 = vmatmul.f32.gmra.mxu0 %v2633_v60  ;;  %800 = vmatmul.f32.gmra.mxu1 %v2635_v11  ;;  %v979_v36 = vpop.f32.mrf.mxu3  ;;  %v2648_v11 = vld [vmem:[#allocation3 + $0x288] sm:$0xff]  ;;  %v557_v60 = vld [vmem:[%s2287_s7 + $0x238] sm:$0xff] }
  0xe6   : > { %v867_v8 = vadd.f32 %v866_v38, %v754_v51  ;;  %3142 = vst [vmem:[#allocation43_spill] sm:$0xff] %v2648_v11  ;;  %1304 = vmatpush.msrb.mxu2 %v557_v60  ;;  %v589_v51 = vld [vmem:[%s2287_s7 + $0x338] sm:$0xff] }
  0xe7   : > { %1417 = vmatpush.msrb.mxu3 %v589_v51  ;;  %v2663_v51 = vld [vmem:[#allocation3 + $0x2a0] sm:$0xff] }
  0xe8   : > { %v980_v50 = vadd.f32 %v979_v36, %v867_v8  ;;  %3145 = vst [vmem:[#allocation46_spill] sm:$0xff] %v2663_v51 }
  0xea   : > { %1719 = vst [vmem:[%s2598_s19 + $0x30] sm:$0xff] %v980_v50  ;;  %916 = vmatmul.f32.gmra.mxu2 %v2639_v9  ;;  %v643_v37 = vpop.f32.mrf.mxu0  ;;  %v756_v62 = vpop.f32.mrf.mxu1  ;;  %1029 = vmatmul.f32.gmra.mxu3 %v2641_v61  ;;  %v493_v9 = vld [vmem:[%s2287_s7 + $0x38] sm:$0xff]  ;;  %v2656_v61 = vld [vmem:[#allocation3 + $0x2b0] sm:$0xff] }
  0xeb   : > { %v757_v38 = vadd.f32 %v756_v62, %v643_v37  ;;  %3143 = vst [vmem:[#allocation44_spill] sm:$0xff] %v2656_v61  ;;  %1078 = vmatpush.msrb.mxu0 %v493_v9 }
  0xed   : > { %v869_v36 = vpop.f32.mrf.mxu2  ;;  %690 = vmatmul.f32.gmra.mxu0 %v2646_v63  ;;  %803 = vmatmul.f32.gmra.mxu1 %v2648_v11  ;;  %v982_v8 = vpop.f32.mrf.mxu3  ;;  %v2688_v63 = vld [vmem:[#allocation3 + $0x2f8] sm:$0xff] }
  0xee   : > { %v870_v50 = vadd.f32 %v869_v36, %v757_v38  ;;  %v2665_v38 = vld [vmem:[#allocation3 + $0x2a8] sm:$0xff]  ;;  %3152 = vst [vmem:[#allocation53_spill] sm:$0xff] %v2688_v63 }
  0xef   : > { %3146 = vst [vmem:[#allocation47_spill] sm:$0xff] %v2665_v38 }
  0xf0   : > { %v983_v37 = vadd.f32 %v982_v8, %v870_v50  ;;  %v2669_v8 = vld [vmem:[#allocation3 + $0x2d0] sm:$0xff]  ;;  %v2671_v50 = vld [vmem:[#allocation3 + $0x2d8] sm:$0xff] }
  0xf1   : > { %3147 = vst [vmem:[#allocation48_spill] sm:$0xff] %v2669_v8 }
  0xf2   : > { %1721 = vst [vmem:[%s2598_s19 + $0x40] sm:$0xff] %v983_v37  ;;  %919 = vmatmul.f32.gmra.mxu2 %v2656_v61  ;;  %v646_v60 = vpop.f32.mrf.mxu0  ;;  %v759_v62 = vpop.f32.mrf.mxu1  ;;  %1032 = vmatmul.f32.gmra.mxu3 %v2658_v39  ;;  %v523_v61 = vld [vmem:[%s2287_s7 + $0x128] sm:$0xff] }
  0xf3   : > { %v760_v36 = vadd.f32 %v759_v62, %v646_v60  ;;  %3148 = vst [vmem:[#allocation49_spill] sm:$0xff] %v2671_v50  ;;  %v2676_v62 = vld [vmem:[#allocation3 + $0x2c0] sm:$0xff]  ;;  %1192 = vmatpush.msrb.mxu1 %v523_v61 }
  0xf4   : > { %3149 = vst [vmem:[#allocation50_spill] sm:$0xff] %v2676_v62 }
  0xf5   : > { %v872_v11 = vpop.f32.mrf.mxu2  ;;  %693 = vmatmul.f32.gmra.mxu0 %v2663_v51  ;;  %806 = vmatmul.f32.gmra.mxu1 %v2665_v38  ;;  %v985_v10 = vpop.f32.mrf.mxu3  ;;  %v2678_v38 = vld [vmem:[#allocation3 + $0x2c8] sm:$0xff] }
  0xf6   : > { %v873_v9 = vadd.f32 %v872_v11, %v760_v36  ;;  %3150 = vst [vmem:[#allocation51_spill] sm:$0xff] %v2678_v38  ;;  %v555_v51 = vld [vmem:[%s2287_s7 + $0x228] sm:$0xff] }
  0xf7   : > { %1305 = vmatpush.msrb.mxu2 %v555_v51  ;;  %v587_v36 = vld [vmem:[%s2287_s7 + $0x328] sm:$0xff] }
  0xf8   : > { %v986_v37 = vadd.f32 %v985_v10, %v873_v9  ;;  %1418 = vmatpush.msrb.mxu3 %v587_v36  ;;  %v2693_v36 = vld [vmem:[#allocation3 + $0x2e0] sm:$0xff] }
  0xf9   : > { %3153 = vst [vmem:[#allocation54_spill] sm:$0xff] %v2693_v36 }
  0xfa   : > { %1723 = vst [vmem:[%s2598_s19 + $0x50] sm:$0xff] %v986_v37  ;;  %922 = vmatmul.f32.gmra.mxu2 %v2669_v8  ;;  %v649_v39 = vpop.f32.mrf.mxu0  ;;  %v762_v60 = vpop.f32.mrf.mxu1  ;;  %1035 = vmatmul.f32.gmra.mxu3 %v2671_v50  ;;  %v491_v8 = vld [vmem:[%s2287_s7 + $0x28] sm:$0xff]  ;;  %v2686_v50 = vld [vmem:[#allocation3 + $0x2f0] sm:$0xff] }
  0xfb   : > { %v763_v11 = vadd.f32 %v762_v60, %v649_v39  ;;  %3151 = vst [vmem:[#allocation52_spill] sm:$0xff] %v2686_v50  ;;  %1079 = vmatpush.msrb.mxu0 %v491_v8 }
  0xfd   : > { %v875_v10 = vpop.f32.mrf.mxu2  ;;  %696 = vmatmul.f32.gmra.mxu0 %v2676_v62  ;;  %809 = vmatmul.f32.gmra.mxu1 %v2678_v38  ;;  %v988_v9 = vpop.f32.mrf.mxu3  ;;  %v2718_v62 = vld [vmem:[#allocation3 + $0x338] sm:$0xff] }
  0xfe   : > { %v876_v37 = vadd.f32 %v875_v10, %v763_v11  ;;  %v2695_v11 = vld [vmem:[#allocation3 + $0x2e8] sm:$0xff]  ;;  %3160 = vst [vmem:[#allocation61_spill] sm:$0xff] %v2718_v62 }
  0xff   : > { %3154 = vst [vmem:[#allocation55_spill] sm:$0xff] %v2695_v11 }
 0x100   : > { %v989_v39 = vadd.f32 %v988_v9, %v876_v37  ;;  %v2699_v9 = vld [vmem:[#allocation3 + $0x310] sm:$0xff]  ;;  %v2701_v37 = vld [vmem:[#allocation3 + $0x318] sm:$0xff] }
 0x101   : > { %3155 = vst [vmem:[#allocation56_spill] sm:$0xff] %v2699_v9 }
 0x102   : > { %1725 = vst [vmem:[%s2598_s19 + $0x60] sm:$0xff] %v989_v39  ;;  %925 = vmatmul.f32.gmra.mxu2 %v2686_v50  ;;  %v652_v51 = vpop.f32.mrf.mxu0  ;;  %v765_v60 = vpop.f32.mrf.mxu1  ;;  %1038 = vmatmul.f32.gmra.mxu3 %v2688_v63  ;;  %v521_v50 = vld [vmem:[%s2287_s7 + $0x118] sm:$0xff] }
 0x103   : > { %v766_v10 = vadd.f32 %v765_v60, %v652_v51  ;;  %3156 = vst [vmem:[#allocation57_spill] sm:$0xff] %v2701_v37  ;;  %v2706_v60 = vld [vmem:[#allocation3 + $0x300] sm:$0xff]  ;;  %1193 = vmatpush.msrb.mxu1 %v521_v50 }
 0x104   : > { %3157 = vst [vmem:[#allocation58_spill] sm:$0xff] %v2706_v60 }
 0x105   : > { %v878_v38 = vpop.f32.mrf.mxu2  ;;  %699 = vmatmul.f32.gmra.mxu0 %v2693_v36  ;;  %812 = vmatmul.f32.gmra.mxu1 %v2695_v11  ;;  %v991_v61 = vpop.f32.mrf.mxu3  ;;  %v2708_v11 = vld [vmem:[#allocation3 + $0x308] sm:$0xff]  ;;  %v553_v36 = vld [vmem:[%s2287_s7 + $0x218] sm:$0xff] }
 0x106   : > { %v879_v8 = vadd.f32 %v878_v38, %v766_v10  ;;  %3158 = vst [vmem:[#allocation59_spill] sm:$0xff] %v2708_v11  ;;  %1306 = vmatpush.msrb.mxu2 %v553_v36  ;;  %v585_v10 = vld [vmem:[%s2287_s7 + $0x318] sm:$0xff] }
 0x107   : > { %1419 = vmatpush.msrb.mxu3 %v585_v10  ;;  %v2723_v10 = vld [vmem:[#allocation3 + $0x320] sm:$0xff] }
 0x108   : > { %v992_v39 = vadd.f32 %v991_v61, %v879_v8  ;;  %3161 = vst [vmem:[#allocation62_spill] sm:$0xff] %v2723_v10 }
 0x10a   : > { %1727 = vst [vmem:[%s2598_s19 + $0x70] sm:$0xff] %v992_v39  ;;  %928 = vmatmul.f32.gmra.mxu2 %v2699_v9  ;;  %v655_v63 = vpop.f32.mrf.mxu0  ;;  %v768_v51 = vpop.f32.mrf.mxu1  ;;  %1041 = vmatmul.f32.gmra.mxu3 %v2701_v37  ;;  %v489_v9 = vld [vmem:[%s2287_s7 + $0x18] sm:$0xff]  ;;  %v2716_v37 = vld [vmem:[#allocation3 + $0x330] sm:$0xff] }
 0x10b   : > { %v769_v38 = vadd.f32 %v768_v51, %v655_v63  ;;  %3159 = vst [vmem:[#allocation60_spill] sm:$0xff] %v2716_v37  ;;  %1080 = vmatpush.msrb.mxu0 %v489_v9 }
 0x10d   : > { %v881_v61 = vpop.f32.mrf.mxu2  ;;  %702 = vmatmul.f32.gmra.mxu0 %v2706_v60  ;;  %815 = vmatmul.f32.gmra.mxu1 %v2708_v11  ;;  %v994_v8 = vpop.f32.mrf.mxu3  ;;  %v2748_v60 = vld [vmem:[#allocation3 + $0x378] sm:$0xff] }
 0x10e   : > { %v882_v39 = vadd.f32 %v881_v61, %v769_v38  ;;  %v2725_v38 = vld [vmem:[#allocation3 + $0x328] sm:$0xff]  ;;  %3168 = vst [vmem:[#allocation69_spill] sm:$0xff] %v2748_v60 }
 0x10f   : > { %3162 = vst [vmem:[#allocation63_spill] sm:$0xff] %v2725_v38 }
 0x110   : > { %v995_v63 = vadd.f32 %v994_v8, %v882_v39  ;;  %v2729_v8 = vld [vmem:[#allocation3 + $0x350] sm:$0xff]  ;;  %v2731_v39 = vld [vmem:[#allocation3 + $0x358] sm:$0xff] }
 0x111   : > { %3163 = vst [vmem:[#allocation64_spill] sm:$0xff] %v2729_v8 }
 0x112   : > { %1729 = vst [vmem:[%s2598_s19 + $0x80] sm:$0xff] %v995_v63  ;;  %931 = vmatmul.f32.gmra.mxu2 %v2716_v37  ;;  %v658_v36 = vpop.f32.mrf.mxu0  ;;  %v771_v51 = vpop.f32.mrf.mxu1  ;;  %1044 = vmatmul.f32.gmra.mxu3 %v2718_v62  ;;  %v519_v37 = vld [vmem:[%s2287_s7 + $0x108] sm:$0xff] }
 0x113   : > { %v772_v61 = vadd.f32 %v771_v51, %v658_v36  ;;  %3164 = vst [vmem:[#allocation65_spill] sm:$0xff] %v2731_v39  ;;  %v2736_v51 = vld [vmem:[#allocation3 + $0x340] sm:$0xff]  ;;  %1194 = vmatpush.msrb.mxu1 %v519_v37 }
 0x114   : > { %3165 = vst [vmem:[#allocation66_spill] sm:$0xff] %v2736_v51 }
 0x115   : > { %v884_v11 = vpop.f32.mrf.mxu2  ;;  %705 = vmatmul.f32.gmra.mxu0 %v2723_v10  ;;  %818 = vmatmul.f32.gmra.mxu1 %v2725_v38  ;;  %v997_v50 = vpop.f32.mrf.mxu3  ;;  %v2738_v38 = vld [vmem:[#allocation3 + $0x348] sm:$0xff] }
 0x116   : > { %v885_v9 = vadd.f32 %v884_v11, %v772_v61  ;;  %3166 = vst [vmem:[#allocation67_spill] sm:$0xff] %v2738_v38  ;;  %v551_v10 = vld [vmem:[%s2287_s7 + $0x208] sm:$0xff] }
 0x117   : > { %1307 = vmatpush.msrb.mxu2 %v551_v10  ;;  %v583_v61 = vld [vmem:[%s2287_s7 + $0x308] sm:$0xff] }
 0x118   : > { %v998_v63 = vadd.f32 %v997_v50, %v885_v9  ;;  %1420 = vmatpush.msrb.mxu3 %v583_v61  ;;  %v2753_v61 = vld [vmem:[#allocation3 + $0x360] sm:$0xff] }
 0x119   : > { %3169 = vst [vmem:[#allocation70_spill] sm:$0xff] %v2753_v61 }
 0x11a   : > { %1731 = vst [vmem:[%s2598_s19 + $0x90] sm:$0xff] %v998_v63  ;;  %934 = vmatmul.f32.gmra.mxu2 %v2729_v8  ;;  %v661_v62 = vpop.f32.mrf.mxu0  ;;  %v774_v36 = vpop.f32.mrf.mxu1  ;;  %1047 = vmatmul.f32.gmra.mxu3 %v2731_v39  ;;  %v487_v8 = vld [vmem:[%s2287_s7 + $0x8] sm:$0xff]  ;;  %v2746_v39 = vld [vmem:[#allocation3 + $0x370] sm:$0xff] }
 0x11b   : > { %v775_v11 = vadd.f32 %v774_v36, %v661_v62  ;;  %3167 = vst [vmem:[#allocation68_spill] sm:$0xff] %v2746_v39  ;;  %1081 = vmatpush.msrb.mxu0 %v487_v8 }
 0x11d   : > { %v887_v50 = vpop.f32.mrf.mxu2  ;;  %708 = vmatmul.f32.gmra.mxu0 %v2736_v51  ;;  %821 = vmatmul.f32.gmra.mxu1 %v2738_v38  ;;  %v1000_v9 = vpop.f32.mrf.mxu3 }
 0x11e   : > { %v888_v63 = vadd.f32 %v887_v50, %v775_v11  ;;  %v2755_v11 = vld [vmem:[#allocation3 + $0x368] sm:$0xff] }
 0x11f   : > { %3170 = vst [vmem:[#allocation71_spill] sm:$0xff] %v2755_v11 }
 0x120   : > { %v1001_v62 = vadd.f32 %v1000_v9, %v888_v63  ;;  %v2759_v9 = vld [vmem:[#allocation3 + $0x390] sm:$0xff]  ;;  %v2761_v63 = vld [vmem:[#allocation3 + $0x398] sm:$0xff] }
 0x121   : > { %3171 = vst [vmem:[#allocation72_spill] sm:$0xff] %v2759_v9 }
 0x122   : > { %1733 = vst [vmem:[%s2598_s19 + $0xa0] sm:$0xff] %v1001_v62  ;;  %937 = vmatmul.f32.gmra.mxu2 %v2746_v39  ;;  %v664_v10 = vpop.f32.mrf.mxu0  ;;  %v777_v36 = vpop.f32.mrf.mxu1  ;;  %1050 = vmatmul.f32.gmra.mxu3 %v2748_v60 }
 0x123   : > { %v778_v50 = vadd.f32 %v777_v36, %v664_v10  ;;  %3172 = vst [vmem:[#allocation73_spill] sm:$0xff] %v2761_v63  ;;  %v2766_v10 = vld [vmem:[#allocation3 + $0x380] sm:$0xff]  ;;  %v2768_v36 = vld [vmem:[#allocation3 + $0x388] sm:$0xff] }
 0x124   : > { %3173 = vst [vmem:[#allocation74_spill] sm:$0xff] %v2766_v10 }
 0x125   : > { %v890_v38 = vpop.f32.mrf.mxu2  ;;  %711 = vmatmul.f32.gmra.mxu0 %v2753_v61  ;;  %824 = vmatmul.f32.gmra.mxu1 %v2755_v11  ;;  %v1003_v37 = vpop.f32.mrf.mxu3  ;;  %3174 = vst [vmem:[#allocation75_spill] sm:$0xff] %v2768_v36 }
 0x126   : > { %v891_v8 = vadd.f32 %v890_v38, %v778_v50 }
 0x128   : > { %v1004_v62 = vadd.f32 %v1003_v37, %v891_v8  ;;  %v2772_v37 = vld [vmem:[#allocation3 + $0x3b0] sm:$0xff]  ;;  %v2774_v8 = vld [vmem:[#allocation3 + $0x3b8] sm:$0xff] }
 0x129   : > { %3175 = vst [vmem:[#allocation76_spill] sm:$0xff] %v2772_v37 }
 0x12a   : > { %1735 = vst [vmem:[%s2598_s19 + $0xb0] sm:$0xff] %v1004_v62  ;;  %940 = vmatmul.f32.gmra.mxu2 %v2759_v9  ;;  %v667_v60 = vpop.f32.mrf.mxu0  ;;  %v780_v39 = vpop.f32.mrf.mxu1  ;;  %1053 = vmatmul.f32.gmra.mxu3 %v2761_v63 }
 0x12b   : > { %v781_v11 = vadd.f32 %v780_v39, %v667_v60  ;;  %3176 = vst [vmem:[#allocation77_spill] sm:$0xff] %v2774_v8  ;;  %v2779_v60 = vld [vmem:[#allocation3 + $0x3a0] sm:$0xff]  ;;  %v2781_v39 = vld [vmem:[#allocation3 + $0x3a8] sm:$0xff] }
 0x12c   : > { %3177 = vst [vmem:[#allocation78_spill] sm:$0xff] %v2779_v60 }
 0x12d   : > { %v893_v61 = vpop.f32.mrf.mxu2  ;;  %714 = vmatmul.f32.gmra.mxu0 %v2766_v10  ;;  %827 = vmatmul.f32.gmra.mxu1 %v2768_v36  ;;  %v1006_v38 = vpop.f32.mrf.mxu3  ;;  %3178 = vst [vmem:[#allocation79_spill] sm:$0xff] %v2781_v39 }
 0x12e   : > { %v894_v50 = vadd.f32 %v893_v61, %v781_v11 }
 0x130   : > { %v1007_v62 = vadd.f32 %v1006_v38, %v894_v50  ;;  %v2785_v38 = vld [vmem:[#allocation3 + $0x3d0] sm:$0xff]  ;;  %v2787_v50 = vld [vmem:[#allocation3 + $0x3d8] sm:$0xff] }
 0x131   : > { %3179 = vst [vmem:[#allocation80_spill] sm:$0xff] %v2785_v38 }
 0x132   : > { %1737 = vst [vmem:[%s2598_s19 + $0xc0] sm:$0xff] %v1007_v62  ;;  %943 = vmatmul.f32.gmra.mxu2 %v2772_v37  ;;  %v670_v63 = vpop.f32.mrf.mxu0  ;;  %v783_v9 = vpop.f32.mrf.mxu1  ;;  %1056 = vmatmul.f32.gmra.mxu3 %v2774_v8 }
 0x133   : > { %v784_v36 = vadd.f32 %v783_v9, %v670_v63  ;;  %3180 = vst [vmem:[#allocation81_spill] sm:$0xff] %v2787_v50  ;;  %v2792_v9 = vld [vmem:[#allocation3 + $0x3c0] sm:$0xff]  ;;  %v2794_v63 = vld [vmem:[#allocation3 + $0x3c8] sm:$0xff] }
 0x134   : > { %3181 = vst [vmem:[#allocation82_spill] sm:$0xff] %v2792_v9 }
 0x135   : > { %v896_v10 = vpop.f32.mrf.mxu2  ;;  %717 = vmatmul.f32.gmra.mxu0 %v2779_v60  ;;  %830 = vmatmul.f32.gmra.mxu1 %v2781_v39  ;;  %v1009_v61 = vpop.f32.mrf.mxu3  ;;  %3182 = vst [vmem:[#allocation83_spill] sm:$0xff] %v2794_v63 }
 0x136   : > { %v897_v11 = vadd.f32 %v896_v10, %v784_v36 }
 0x138   : > { %v1010_v62 = vadd.f32 %v1009_v61, %v897_v11  ;;  %v2798_v61 = vld [vmem:[#allocation3 + $0x3f0] sm:$0xff]  ;;  %v2800_v11 = vld [vmem:[#allocation3 + $0x3f8] sm:$0xff] }
 0x139   : > { %3183 = vst [vmem:[#allocation84_spill] sm:$0xff] %v2798_v61 }
 0x13a   : > { %1739 = vst [vmem:[%s2598_s19 + $0xd0] sm:$0xff] %v1010_v62  ;;  %946 = vmatmul.f32.gmra.mxu2 %v2785_v38  ;;  %v673_v8 = vpop.f32.mrf.mxu0  ;;  %v786_v37 = vpop.f32.mrf.mxu1  ;;  %1059 = vmatmul.f32.gmra.mxu3 %v2787_v50 }
 0x13b   : > { %v787_v39 = vadd.f32 %v786_v37, %v673_v8  ;;  %3184 = vst [vmem:[#allocation85_spill] sm:$0xff] %v2800_v11  ;;  %v2805_v37 = vld [vmem:[#allocation3 + $0x3e0] sm:$0xff]  ;;  %v2807_v8 = vld [vmem:[#allocation3 + $0x3e8] sm:$0xff] }
 0x13c   : > { %3185 = vst [vmem:[#allocation86_spill] sm:$0xff] %v2805_v37 }
 0x13d   : > { %v899_v60 = vpop.f32.mrf.mxu2  ;;  %720 = vmatmul.f32.gmra.mxu0 %v2792_v9  ;;  %833 = vmatmul.f32.gmra.mxu1 %v2794_v63  ;;  %v1012_v10 = vpop.f32.mrf.mxu3  ;;  %3186 = vst [vmem:[#allocation87_spill] sm:$0xff] %v2807_v8 }
 0x13e   : > { %v900_v36 = vadd.f32 %v899_v60, %v787_v39 }
 0x140   : > { %v1013_v62 = vadd.f32 %v1012_v10, %v900_v36  ;;  %v2002_v36 = vld [vmem:[#allocation3 + $0x10] sm:$0xff] }
 0x142   : > { %1741 = vst [vmem:[%s2598_s19 + $0xe0] sm:$0xff] %v1013_v62  ;;  %949 = vmatmul.f32.gmra.mxu2 %v2798_v61  ;;  %v676_v50 = vpop.f32.mrf.mxu0  ;;  %v789_v38 = vpop.f32.mrf.mxu1  ;;  %1062 = vmatmul.f32.gmra.mxu3 %v2800_v11  ;;  %v2003_v11 = vld [vmem:[#allocation3 + $0x18] sm:$0xff] }
 0x143   : > { %v790_v63 = vadd.f32 %v789_v38, %v676_v50  ;;  %v2005_v38 = vld [vmem:[#allocation3 + $0x8] sm:$0xff] }
 0x145   : > { %v902_v9 = vpop.f32.mrf.mxu2  ;;  %723 = vmatmul.f32.gmra.mxu0 %v2805_v37  ;;  %836 = vmatmul.f32.gmra.mxu1 %v2807_v8  ;;  %v1015_v60 = vpop.f32.mrf.mxu3 }
 0x146   : > { %v903_v39 = vadd.f32 %v902_v9, %v790_v63 }
 0x148   : > { %v1016_v10 = vadd.f32 %v1015_v60, %v903_v39 }
 0x14a   : > { %1743 = vst [vmem:[%s2598_s19 + $0xf0] sm:$0xff] %v1016_v10  ;;  %1308 = vmatmul.f32.vlgmr.msrb.gmra.mxu2 %v2002_v36  ;;  %v679_v62 = vpop.f32.mrf.mxu0  ;;  %v792_v61 = vpop.f32.mrf.mxu1  ;;  %1421 = vmatmul.f32.vlgmr.msrb.gmra.mxu3 %v2003_v11 }
 0x14b   : > { %v793_v51 = vadd.f32 %v792_v61, %v679_v62 }
 0x14d   : > { %v905_v49 = vpop.f32.mrf.mxu2  ;;  %1082 = vmatmul.f32.vlgmr.msrb.gmra.mxu0 %v2004_v48  ;;  %1195 = vmatmul.f32.vlgmr.msrb.gmra.mxu1 %v2005_v38  ;;  %v1018_v50 = vpop.f32.mrf.mxu3 }
 0x14e   : > { %v906_v8 = vadd.f32 %v905_v49, %v793_v51 }
 0x150   : > { %v1019_v37 = vadd.f32 %v1018_v50, %v906_v8 }
 0x152   : > { %1745 = vst [vmem:[%s2598_s19 + $0x100] sm:$0xff] %v1019_v37  ;;  %1311 = vmatmul.f32.gmra.mxu2 %v2367_v14  ;;  %v682_v9 = vpop.f32.mrf.mxu0  ;;  %v795_v63 = vpop.f32.mrf.mxu1  ;;  %1424 = vmatmul.f32.gmra.mxu3 %v2369_v15 }
 0x153   : > { %v796_v60 = vadd.f32 %v795_v63, %v682_v9 }
 0x155   : > { %v908_v39 = vpop.f32.mrf.mxu2  ;;  %1085 = vmatmul.f32.gmra.mxu0 %v2375_v18  ;;  %1198 = vmatmul.f32.gmra.mxu1 %v2377_v19  ;;  %v1021_v48 = vpop.f32.mrf.mxu3 }
 0x156   : > { %v909_v61 = vadd.f32 %v908_v39, %v796_v60 }
 0x158   : > { %v1022_v11 = vadd.f32 %v1021_v48, %v909_v61 }
 0x15a   : > { %1747 = vst [vmem:[%s2598_s19 + $0x110] sm:$0xff] %v1022_v11  ;;  %1314 = vmatmul.f32.gmra.mxu2 %v2381_v20  ;;  %v685_v49 = vpop.f32.mrf.mxu0  ;;  %v798_v51 = vpop.f32.mrf.mxu1  ;;  %1427 = vmatmul.f32.gmra.mxu3 %v2383_v21 }
 0x15b   : > { %v799_v14 = vadd.f32 %v798_v51, %v685_v49 }
 0x15d   : > { %v911_v37 = vpop.f32.mrf.mxu2  ;;  %1088 = vmatmul.f32.gmra.mxu0 %v2385_v22  ;;  %1201 = vmatmul.f32.gmra.mxu1 %v2389_v23  ;;  %v1024_v15 = vpop.f32.mrf.mxu3 }
 0x15e   : > { %v912_v18 = vadd.f32 %v911_v37, %v799_v14 }
 0x160   : > { %v1025_v19 = vadd.f32 %v1024_v15, %v912_v18 }
 0x162   : > { %1749 = vst [vmem:[%s2598_s19 + $0x120] sm:$0xff] %v1025_v19  ;;  %1317 = vmatmul.f32.gmra.mxu2 %v2397_v28  ;;  %v688_v8 = vpop.f32.mrf.mxu0  ;;  %v801_v10 = vpop.f32.mrf.mxu1  ;;  %1430 = vmatmul.f32.gmra.mxu3 %v2399_v29 }
 0x163   : > { %v802_v20 = vadd.f32 %v801_v10, %v688_v8 }
 0x165   : > { %v914_v36 = vpop.f32.mrf.mxu2  ;;  %1091 = vmatmul.f32.gmra.mxu0 %v2403_v30  ;;  %1204 = vmatmul.f32.gmra.mxu1 %v2405_v31  ;;  %v1027_v21 = vpop.f32.mrf.mxu3 }
 0x166   : > { %v915_v22 = vadd.f32 %v914_v36, %v802_v20 }
 0x168   : > { %v1028_v23 = vadd.f32 %v1027_v21, %v915_v22 }
 0x16a   : > { %1751 = vst [vmem:[%s2598_s19 + $0x130] sm:$0xff] %v1028_v23  ;;  %1320 = vmatmul.f32.gmra.mxu2 %v2409_v32  ;;  %v691_v62 = vpop.f32.mrf.mxu0  ;;  %v804_v38 = vpop.f32.mrf.mxu1  ;;  %1433 = vmatmul.f32.gmra.mxu3 %v2411_v33 }
 0x16b   : > { %v805_v28 = vadd.f32 %v804_v38, %v691_v62 }
 0x16d   : > { %v917_v50 = vpop.f32.mrf.mxu2  ;;  %1094 = vmatmul.f32.gmra.mxu0 %v2413_v34  ;;  %1207 = vmatmul.f32.gmra.mxu1 %v2417_v35  ;;  %v1030_v29 = vpop.f32.mrf.mxu3 }
 0x16e   : > { %v918_v30 = vadd.f32 %v917_v50, %v805_v28  ;;  %v3187_v50 = vld [vmem:[#allocation12_spill] sm:$0xff] }
 0x170   : > { %v1031_v31 = vadd.f32 %v1030_v29, %v918_v30 }
 0x172   : > { %1753 = vst [vmem:[%s2598_s19 + $0x140] sm:$0xff] %v1031_v31  ;;  %1323 = vmatmul.f32.gmra.mxu2 %v2425_v40  ;;  %v694_v9 = vpop.f32.mrf.mxu0  ;;  %v807_v63 = vpop.f32.mrf.mxu1  ;;  %1436 = vmatmul.f32.gmra.mxu3 %v2427_v41 }
 0x173   : > { %v808_v32 = vadd.f32 %v807_v63, %v694_v9  ;;  %v3190_v63 = vld [vmem:[#allocation15_spill] sm:$0xff] }
 0x175   : > { %v920_v60 = vpop.f32.mrf.mxu2  ;;  %1097 = vmatmul.f32.gmra.mxu0 %v2431_v42  ;;  %1210 = vmatmul.f32.gmra.mxu1 %v2433_v43  ;;  %v1033_v33 = vpop.f32.mrf.mxu3 }
 0x176   : > { %v921_v34 = vadd.f32 %v920_v60, %v808_v32  ;;  %v3191_v60 = vld [vmem:[#allocation16_spill] sm:$0xff] }
 0x178   : > { %v1034_v35 = vadd.f32 %v1033_v33, %v921_v34 }
 0x17a   : > { %1755 = vst [vmem:[%s2598_s19 + $0x150] sm:$0xff] %v1034_v35  ;;  %1326 = vmatmul.f32.gmra.mxu2 %v2437_v44  ;;  %v697_v39 = vpop.f32.mrf.mxu0  ;;  %v810_v48 = vpop.f32.mrf.mxu1  ;;  %1439 = vmatmul.f32.gmra.mxu3 %v2439_v45  ;;  %v3192_v35 = vld [vmem:[#allocation17_spill] sm:$0xff] }
 0x17b   : > { %v811_v40 = vadd.f32 %v810_v48, %v697_v39 }
 0x17d   : > { %v923_v61 = vpop.f32.mrf.mxu2  ;;  %1100 = vmatmul.f32.gmra.mxu0 %v2441_v46  ;;  %1213 = vmatmul.f32.gmra.mxu1 %v2445_v47  ;;  %v1036_v41 = vpop.f32.mrf.mxu3 }
 0x17e   : > { %v924_v42 = vadd.f32 %v923_v61, %v811_v40  ;;  %v3193_v40 = vld [vmem:[#allocation18_spill] sm:$0xff]  ;;  %v3194_v61 = vld [vmem:[#allocation19_spill] sm:$0xff] }
 0x180   : > { %v1037_v43 = vadd.f32 %v1036_v41, %v924_v42 }
 0x182   : > { %1757 = vst [vmem:[%s2598_s19 + $0x160] sm:$0xff] %v1037_v43  ;;  %1329 = vmatmul.f32.gmra.mxu2 %v2453_v52  ;;  %v700_v11 = vpop.f32.mrf.mxu0  ;;  %v813_v49 = vpop.f32.mrf.mxu1  ;;  %1442 = vmatmul.f32.gmra.mxu3 %v2455_v53 }
 0x183   : > { %v814_v44 = vadd.f32 %v813_v49, %v700_v11  ;;  %v3195_v11 = vld [vmem:[#allocation20_spill] sm:$0xff] }
 0x185   : > { %v926_v51 = vpop.f32.mrf.mxu2  ;;  %1103 = vmatmul.f32.gmra.mxu0 %v2459_v54  ;;  %1216 = vmatmul.f32.gmra.mxu1 %v2461_v55  ;;  %v1039_v45 = vpop.f32.mrf.mxu3 }
 0x186   : > { %v927_v46 = vadd.f32 %v926_v51, %v814_v44  ;;  %v3196_v51 = vld [vmem:[#allocation21_spill] sm:$0xff] }
 0x188   : > { %v1040_v47 = vadd.f32 %v1039_v45, %v927_v46 }
 0x18a   : > { %1759 = vst [vmem:[%s2598_s19 + $0x170] sm:$0xff] %v1040_v47  ;;  %1332 = vmatmul.f32.gmra.mxu2 %v2465_v56  ;;  %v703_v14 = vpop.f32.mrf.mxu0  ;;  %v816_v37 = vpop.f32.mrf.mxu1  ;;  %1445 = vmatmul.f32.gmra.mxu3 %v2467_v57  ;;  %v3197_v47 = vld [vmem:[#allocation22_spill] sm:$0xff] }
 0x18b   : > { %v817_v52 = vadd.f32 %v816_v37, %v703_v14  ;;  %v3198_v14 = vld [vmem:[#allocation23_spill] sm:$0xff] }
 0x18d   : > { %v929_v15 = vpop.f32.mrf.mxu2  ;;  %1106 = vmatmul.f32.gmra.mxu0 %v2469_v58  ;;  %1219 = vmatmul.f32.gmra.mxu1 %v2473_v59  ;;  %v1042_v53 = vpop.f32.mrf.mxu3 }
 0x18e   : > { %v930_v54 = vadd.f32 %v929_v15, %v817_v52 }
 0x190   : > { %v1043_v55 = vadd.f32 %v1042_v53, %v930_v54  ;;  %v3199_v53 = vld [vmem:[#allocation24_spill] sm:$0xff] }
 0x192   : > { %1761 = vst [vmem:[%s2598_s19 + $0x180] sm:$0xff] %v1043_v55  ;;  %1335 = vmatmul.f32.gmra.mxu2 %v2481_v0  ;;  %v706_v18 = vpop.f32.mrf.mxu0  ;;  %v819_v19 = vpop.f32.mrf.mxu1  ;;  %1448 = vmatmul.f32.gmra.mxu3 %v2483_v1 }
 0x193   : > { %v820_v56 = vadd.f32 %v819_v19, %v706_v18  ;;  %v3200_v18 = vld [vmem:[#allocation25_spill] sm:$0xff] }
 0x195   : > { %v932_v8 = vpop.f32.mrf.mxu2  ;;  %1109 = vmatmul.f32.gmra.mxu0 %v2487_v2  ;;  %1222 = vmatmul.f32.gmra.mxu1 %v2489_v3  ;;  %v1045_v57 = vpop.f32.mrf.mxu3 }
 0x196   : > { %v933_v58 = vadd.f32 %v932_v8, %v820_v56  ;;  %v3201_v8 = vld [vmem:[#allocation26_spill] sm:$0xff] }
 0x198   : > { %v1046_v59 = vadd.f32 %v1045_v57, %v933_v58  ;;  %v3202_v57 = vld [vmem:[#allocation27_spill] sm:$0xff] }
 0x19a   : > { %1763 = vst [vmem:[%s2598_s19 + $0x190] sm:$0xff] %v1046_v59  ;;  %1338 = vmatmul.f32.gmra.mxu2 %v2493_v4  ;;  %v709_v10 = vpop.f32.mrf.mxu0  ;;  %v822_v20 = vpop.f32.mrf.mxu1  ;;  %1451 = vmatmul.f32.gmra.mxu3 %v2495_v5 }
 0x19b   : > { %v823_v0 = vadd.f32 %v822_v20, %v709_v10  ;;  %v3203_v20 = vld [vmem:[#allocation28_spill] sm:$0xff] }
 0x19d   : > { %v935_v36 = vpop.f32.mrf.mxu2  ;;  %1112 = vmatmul.f32.gmra.mxu0 %v2497_v6  ;;  %1225 = vmatmul.f32.gmra.mxu1 %v2501_v7  ;;  %v1048_v1 = vpop.f32.mrf.mxu3 }
 0x19e   : > { %v936_v2 = vadd.f32 %v935_v36, %v823_v0 }
 0x1a0   : > { %v1049_v3 = vadd.f32 %v1048_v1, %v936_v2  ;;  %v3204_v1 = vld [vmem:[#allocation29_spill] sm:$0xff] }
 0x1a2   : > { %1765 = vst [vmem:[%s2598_s19 + $0x1a0] sm:$0xff] %v1049_v3  ;;  %1341 = vmatmul.f32.gmra.mxu2 %v2509_v12  ;;  %v712_v21 = vpop.f32.mrf.mxu0  ;;  %v825_v22 = vpop.f32.mrf.mxu1  ;;  %1454 = vmatmul.f32.gmra.mxu3 %v2511_v13 }
 0x1a3   : > { %v826_v4 = vadd.f32 %v825_v22, %v712_v21  ;;  %v3205_v21 = vld [vmem:[#allocation30_spill] sm:$0xff]  ;;  %v3206_v22 = vld [vmem:[#allocation31_spill] sm:$0xff] }
 0x1a5   : > { %v938_v23 = vpop.f32.mrf.mxu2  ;;  %1115 = vmatmul.f32.gmra.mxu0 %v2515_v16  ;;  %1228 = vmatmul.f32.gmra.mxu1 %v2517_v17  ;;  %v1051_v5 = vpop.f32.mrf.mxu3 }
 0x1a6   : > { %v939_v6 = vadd.f32 %v938_v23, %v826_v4 }
 0x1a8   : > { %v1052_v7 = vadd.f32 %v1051_v5, %v939_v6  ;;  %v3207_v6 = vld [vmem:[#allocation32_spill] sm:$0xff] }
 0x1aa   : > { %1767 = vst [vmem:[%s2598_s19 + $0x1b0] sm:$0xff] %v1052_v7  ;;  %1344 = vmatmul.f32.gmra.mxu2 %v2521_v24  ;;  %v715_v62 = vpop.f32.mrf.mxu0  ;;  %v828_v38 = vpop.f32.mrf.mxu1  ;;  %1457 = vmatmul.f32.gmra.mxu3 %v2523_v25  ;;  %v3188_v24 = vld [vmem:[#allocation13_spill] sm:$0xff]  ;;  %v3189_v25 = vld [vmem:[#allocation14_spill] sm:$0xff] }
 0x1ab   : > { %v829_v12 = vadd.f32 %v828_v38, %v715_v62  ;;  %v3208_v38 = vld [vmem:[#allocation33_spill] sm:$0xff] }
 0x1ad   : > { %v941_v28 = vpop.f32.mrf.mxu2  ;;  %1118 = vmatmul.f32.gmra.mxu0 %v2527_v26  ;;  %1231 = vmatmul.f32.gmra.mxu1 %v2529_v27  ;;  %v1054_v13 = vpop.f32.mrf.mxu3 }
 0x1ae   : > { %v942_v16 = vadd.f32 %v941_v28, %v829_v12 }
 0x1b0   : > { %v1055_v17 = vadd.f32 %v1054_v13, %v942_v16  ;;  %v3209_v13 = vld [vmem:[#allocation34_spill] sm:$0xff]  ;;  %v3210_v16 = vld [vmem:[#allocation35_spill] sm:$0xff] }
 0x1b2   : > { %1769 = vst [vmem:[%s2598_s19 + $0x1c0] sm:$0xff] %v1055_v17  ;;  %1347 = vmatmul.f32.gmra.mxu2 %v3187_v50  ;;  %v718_v29 = vpop.f32.mrf.mxu0  ;;  %v831_v30 = vpop.f32.mrf.mxu1  ;;  %1460 = vmatmul.f32.gmra.mxu3 %v3188_v24 }
 0x1b3   : > { %v832_v31 = vadd.f32 %v831_v30, %v718_v29  ;;  %v3211_v30 = vld [vmem:[#allocation36_spill] sm:$0xff] }
 0x1b5   : > { %v944_v9 = vpop.f32.mrf.mxu2  ;;  %1121 = vmatmul.f32.gmra.mxu0 %v3189_v25  ;;  %1234 = vmatmul.f32.gmra.mxu1 %v3190_v63  ;;  %v1057_v26 = vpop.f32.mrf.mxu3 }
 0x1b6   : > { %v945_v27 = vadd.f32 %v944_v9, %v832_v31  ;;  %v3212_v9 = vld [vmem:[#allocation37_spill] sm:$0xff] }
 0x1b8   : > { %v1058_v32 = vadd.f32 %v1057_v26, %v945_v27  ;;  %v3213_v26 = vld [vmem:[#allocation38_spill] sm:$0xff]  ;;  %v3214_v27 = vld [vmem:[#allocation39_spill] sm:$0xff] }
 0x1ba   : > { %1771 = vst [vmem:[%s2598_s19 + $0x1d0] sm:$0xff] %v1058_v32  ;;  %1350 = vmatmul.f32.gmra.mxu2 %v3191_v60  ;;  %v721_v33 = vpop.f32.mrf.mxu0  ;;  %v834_v34 = vpop.f32.mrf.mxu1  ;;  %1463 = vmatmul.f32.gmra.mxu3 %v3192_v35 }
 0x1bb   : > { %v835_v39 = vadd.f32 %v834_v34, %v721_v33  ;;  %v3215_v34 = vld [vmem:[#allocation40_spill] sm:$0xff] }
 0x1bd   : > { %v947_v48 = vpop.f32.mrf.mxu2  ;;  %1124 = vmatmul.f32.gmra.mxu0 %v3193_v40  ;;  %1237 = vmatmul.f32.gmra.mxu1 %v3194_v61  ;;  %v1060_v41 = vpop.f32.mrf.mxu3 }
 0x1be   : > { %v948_v42 = vadd.f32 %v947_v48, %v835_v39  ;;  %v3216_v48 = vld [vmem:[#allocation41_spill] sm:$0xff] }
 0x1c0   : > { %v1061_v43 = vadd.f32 %v1060_v41, %v948_v42  ;;  %v3217_v41 = vld [vmem:[#allocation42_spill] sm:$0xff]  ;;  %v3218_v42 = vld [vmem:[#allocation43_spill] sm:$0xff] }
 0x1c2   : > { %1773 = vst [vmem:[%s2598_s19 + $0x1e0] sm:$0xff] %v1061_v43  ;;  %1353 = vmatmul.f32.gmra.mxu2 %v3195_v11  ;;  %v724_v49 = vpop.f32.mrf.mxu0  ;;  %v837_v44 = vpop.f32.mrf.mxu1  ;;  %1466 = vmatmul.f32.gmra.mxu3 %v3196_v51 }
 0x1c3   : > { %v838_v45 = vadd.f32 %v837_v44, %v724_v49  ;;  %v3219_v44 = vld [vmem:[#allocation44_spill] sm:$0xff] }
 0x1c5   : > { %v950_v46 = vpop.f32.mrf.mxu2  ;;  %1127 = vmatmul.f32.gmra.mxu0 %v3197_v47  ;;  %1240 = vmatmul.f32.gmra.mxu1 %v3198_v14  ;;  %v1063_v37 = vpop.f32.mrf.mxu3 }
 0x1c6   : > { %v951_v52 = vadd.f32 %v950_v46, %v838_v45  ;;  %v3220_v46 = vld [vmem:[#allocation45_spill] sm:$0xff] }
 0x1c8   : > { %v1064_v15 = vadd.f32 %v1063_v37, %v951_v52  ;;  %v3221_v37 = vld [vmem:[#allocation46_spill] sm:$0xff]  ;;  %v3222_v52 = vld [vmem:[#allocation47_spill] sm:$0xff] }
 0x1ca   : > { %1775 = vst [vmem:[%s2598_s19 + $0x1f0] sm:$0xff] %v1064_v15  ;;  %1356 = vmatmul.f32.gmra.mxu2 %v3199_v53  ;;  %v1083_v54 = vpop.f32.mrf.mxu0  ;;  %v1196_v55 = vpop.f32.mrf.mxu1  ;;  %1469 = vmatmul.f32.gmra.mxu3 %v3200_v18 }
 0x1cb   : > { %v1197_v19 = vadd.f32 %v1196_v55, %v1083_v54  ;;  %v3223_v55 = vld [vmem:[#allocation48_spill] sm:$0xff] }
 0x1cd   : > { %v1309_v56 = vpop.f32.mrf.mxu2  ;;  %1130 = vmatmul.f32.gmra.mxu0 %v3201_v8  ;;  %1243 = vmatmul.f32.gmra.mxu1 %v3202_v57  ;;  %v1422_v58 = vpop.f32.mrf.mxu3 }
 0x1ce   : > { %v1310_v59 = vadd.f32 %v1309_v56, %v1197_v19  ;;  %v3224_v56 = vld [vmem:[#allocation49_spill] sm:$0xff] }
 0x1d0   : > { %v1423_v10 = vadd.f32 %v1422_v58, %v1310_v59  ;;  %v3225_v58 = vld [vmem:[#allocation50_spill] sm:$0xff]  ;;  %v3226_v59 = vld [vmem:[#allocation51_spill] sm:$0xff] }
 0x1d2   : > { %1714 = vst [vmem:[%s2598_s19 + $0x8] sm:$0xff] %v1423_v10  ;;  %1359 = vmatmul.f32.gmra.mxu2 %v3203_v20  ;;  %v1086_v0 = vpop.f32.mrf.mxu0  ;;  %v1199_v36 = vpop.f32.mrf.mxu1  ;;  %1472 = vmatmul.f32.gmra.mxu3 %v3204_v1 }
 0x1d3   : > { %v1200_v2 = vadd.f32 %v1199_v36, %v1086_v0  ;;  %v3227_v36 = vld [vmem:[#allocation52_spill] sm:$0xff] }
 0x1d5   : > { %v1312_v3 = vpop.f32.mrf.mxu2  ;;  %1133 = vmatmul.f32.gmra.mxu0 %v3205_v21  ;;  %1246 = vmatmul.f32.gmra.mxu1 %v3206_v22  ;;  %v1425_v4 = vpop.f32.mrf.mxu3 }
 0x1d6   : > { %v1313_v23 = vadd.f32 %v1312_v3, %v1200_v2  ;;  %v3228_v3 = vld [vmem:[#allocation53_spill] sm:$0xff] }
 0x1d8   : > { %v1426_v5 = vadd.f32 %v1425_v4, %v1313_v23  ;;  %v3229_v4 = vld [vmem:[#allocation54_spill] sm:$0xff]  ;;  %v3230_v23 = vld [vmem:[#allocation55_spill] sm:$0xff] }
 0x1da   : > { %1716 = vst [vmem:[%s2598_s19 + $0x18] sm:$0xff] %v1426_v5  ;;  %1362 = vmatmul.f32.gmra.mxu2 %v3207_v6  ;;  %v1089_v7 = vpop.f32.mrf.mxu0  ;;  %v1202_v62 = vpop.f32.mrf.mxu1  ;;  %1475 = vmatmul.f32.gmra.mxu3 %v3208_v38 }
 0x1db   : > { %v1203_v12 = vadd.f32 %v1202_v62, %v1089_v7  ;;  %v3231_v62 = vld [vmem:[#allocation56_spill] sm:$0xff] }
 0x1dd   : > { %v1315_v28 = vpop.f32.mrf.mxu2  ;;  %1136 = vmatmul.f32.gmra.mxu0 %v3209_v13  ;;  %1249 = vmatmul.f32.gmra.mxu1 %v3210_v16  ;;  %v1428_v17 = vpop.f32.mrf.mxu3 }
 0x1de   : > { %v1316_v50 = vadd.f32 %v1315_v28, %v1203_v12  ;;  %v3232_v28 = vld [vmem:[#allocation57_spill] sm:$0xff] }
 0x1e0   : > { %v1429_v29 = vadd.f32 %v1428_v17, %v1316_v50  ;;  %v3233_v17 = vld [vmem:[#allocation58_spill] sm:$0xff]  ;;  %v3234_v50 = vld [vmem:[#allocation59_spill] sm:$0xff] }
 0x1e2   : > { %1718 = vst [vmem:[%s2598_s19 + $0x28] sm:$0xff] %v1429_v29  ;;  %1365 = vmatmul.f32.gmra.mxu2 %v3211_v30  ;;  %v1092_v24 = vpop.f32.mrf.mxu0  ;;  %v1205_v31 = vpop.f32.mrf.mxu1  ;;  %1478 = vmatmul.f32.gmra.mxu3 %v3212_v9 }
 0x1e3   : > { %v1206_v25 = vadd.f32 %v1205_v31, %v1092_v24  ;;  %v3235_v31 = vld [vmem:[#allocation60_spill] sm:$0xff] }
 0x1e5   : > { %v1318_v63 = vpop.f32.mrf.mxu2  ;;  %1139 = vmatmul.f32.gmra.mxu0 %v3213_v26  ;;  %1252 = vmatmul.f32.gmra.mxu1 %v3214_v27  ;;  %v1431_v32 = vpop.f32.mrf.mxu3 }
 0x1e6   : > { %v1319_v60 = vadd.f32 %v1318_v63, %v1206_v25  ;;  %v3236_v63 = vld [vmem:[#allocation61_spill] sm:$0xff] }
 0x1e8   : > { %v1432_v33 = vadd.f32 %v1431_v32, %v1319_v60  ;;  %v3237_v32 = vld [vmem:[#allocation62_spill] sm:$0xff]  ;;  %v3238_v60 = vld [vmem:[#allocation63_spill] sm:$0xff] }
 0x1ea   : > { %1720 = vst [vmem:[%s2598_s19 + $0x38] sm:$0xff] %v1432_v33  ;;  %1368 = vmatmul.f32.gmra.mxu2 %v3215_v34  ;;  %v1095_v35 = vpop.f32.mrf.mxu0  ;;  %v1208_v39 = vpop.f32.mrf.mxu1  ;;  %1481 = vmatmul.f32.gmra.mxu3 %v3216_v48 }
 0x1eb   : > { %v1209_v40 = vadd.f32 %v1208_v39, %v1095_v35  ;;  %v3239_v39 = vld [vmem:[#allocation64_spill] sm:$0xff] }
 0x1ed   : > { %v1321_v61 = vpop.f32.mrf.mxu2  ;;  %1142 = vmatmul.f32.gmra.mxu0 %v3217_v41  ;;  %1255 = vmatmul.f32.gmra.mxu1 %v3218_v42  ;;  %v1434_v43 = vpop.f32.mrf.mxu3 }
 0x1ee   : > { %v1322_v11 = vadd.f32 %v1321_v61, %v1209_v40  ;;  %v3240_v61 = vld [vmem:[#allocation65_spill] sm:$0xff] }
 0x1f0   : > { %v1435_v49 = vadd.f32 %v1434_v43, %v1322_v11  ;;  %v3241_v43 = vld [vmem:[#allocation66_spill] sm:$0xff]  ;;  %v3242_v11 = vld [vmem:[#allocation67_spill] sm:$0xff] }
 0x1f2   : > { %1722 = vst [vmem:[%s2598_s19 + $0x48] sm:$0xff] %v1435_v49  ;;  %1371 = vmatmul.f32.gmra.mxu2 %v3219_v44  ;;  %v1098_v51 = vpop.f32.mrf.mxu0  ;;  %v1211_v45 = vpop.f32.mrf.mxu1  ;;  %1484 = vmatmul.f32.gmra.mxu3 %v3220_v46 }
 0x1f3   : > { %v1212_v47 = vadd.f32 %v1211_v45, %v1098_v51  ;;  %v3243_v45 = vld [vmem:[#allocation68_spill] sm:$0xff] }
 0x1f5   : > { %v1324_v14 = vpop.f32.mrf.mxu2  ;;  %1145 = vmatmul.f32.gmra.mxu0 %v3221_v37  ;;  %1258 = vmatmul.f32.gmra.mxu1 %v3222_v52  ;;  %v1437_v15 = vpop.f32.mrf.mxu3 }
 0x1f6   : > { %v1325_v53 = vadd.f32 %v1324_v14, %v1212_v47  ;;  %v3244_v14 = vld [vmem:[#allocation69_spill] sm:$0xff] }
 0x1f8   : > { %v1438_v54 = vadd.f32 %v1437_v15, %v1325_v53  ;;  %v3245_v15 = vld [vmem:[#allocation70_spill] sm:$0xff]  ;;  %v3246_v53 = vld [vmem:[#allocation71_spill] sm:$0xff] }
 0x1fa   : > { %1724 = vst [vmem:[%s2598_s19 + $0x58] sm:$0xff] %v1438_v54  ;;  %1374 = vmatmul.f32.gmra.mxu2 %v3223_v55  ;;  %v1101_v18 = vpop.f32.mrf.mxu0  ;;  %v1214_v19 = vpop.f32.mrf.mxu1  ;;  %1487 = vmatmul.f32.gmra.mxu3 %v3224_v56 }
 0x1fb   : > { %v1215_v8 = vadd.f32 %v1214_v19, %v1101_v18  ;;  %v3247_v19 = vld [vmem:[#allocation72_spill] sm:$0xff] }
 0x1fd   : > { %v1327_v57 = vpop.f32.mrf.mxu2  ;;  %1148 = vmatmul.f32.gmra.mxu0 %v3225_v58  ;;  %1261 = vmatmul.f32.gmra.mxu1 %v3226_v59  ;;  %v1440_v10 = vpop.f32.mrf.mxu3 }
 0x1fe   : > { %v1328_v20 = vadd.f32 %v1327_v57, %v1215_v8  ;;  %v3248_v57 = vld [vmem:[#allocation73_spill] sm:$0xff] }
 0x200   : > { %v1441_v0 = vadd.f32 %v1440_v10, %v1328_v20  ;;  %v3249_v10 = vld [vmem:[#allocation74_spill] sm:$0xff]  ;;  %v3250_v20 = vld [vmem:[#allocation75_spill] sm:$0xff] }
 0x202   : > { %1726 = vst [vmem:[%s2598_s19 + $0x68] sm:$0xff] %v1441_v0  ;;  %1377 = vmatmul.f32.gmra.mxu2 %v3227_v36  ;;  %v1104_v1 = vpop.f32.mrf.mxu0  ;;  %v1217_v2 = vpop.f32.mrf.mxu1  ;;  %1490 = vmatmul.f32.gmra.mxu3 %v3228_v3 }
 0x203   : > { %v1218_v21 = vadd.f32 %v1217_v2, %v1104_v1  ;;  %v3251_v2 = vld [vmem:[#allocation76_spill] sm:$0xff] }
 0x205   : > { %v1330_v22 = vpop.f32.mrf.mxu2  ;;  %1151 = vmatmul.f32.gmra.mxu0 %v3229_v4  ;;  %1264 = vmatmul.f32.gmra.mxu1 %v3230_v23  ;;  %v1443_v5 = vpop.f32.mrf.mxu3 }
 0x206   : > { %v1331_v6 = vadd.f32 %v1330_v22, %v1218_v21  ;;  %v3252_v22 = vld [vmem:[#allocation77_spill] sm:$0xff] }
 0x208   : > { %v1444_v7 = vadd.f32 %v1443_v5, %v1331_v6  ;;  %v3253_v5 = vld [vmem:[#allocation78_spill] sm:$0xff]  ;;  %v3254_v6 = vld [vmem:[#allocation79_spill] sm:$0xff] }
 0x20a   : > { %1728 = vst [vmem:[%s2598_s19 + $0x78] sm:$0xff] %v1444_v7  ;;  %1380 = vmatmul.f32.gmra.mxu2 %v3231_v62  ;;  %v1107_v38 = vpop.f32.mrf.mxu0  ;;  %v1220_v12 = vpop.f32.mrf.mxu1  ;;  %1493 = vmatmul.f32.gmra.mxu3 %v3232_v28 }
 0x20b   : > { %v1221_v13 = vadd.f32 %v1220_v12, %v1107_v38  ;;  %v3255_v12 = vld [vmem:[#allocation80_spill] sm:$0xff] }
 0x20d   : > { %v1333_v16 = vpop.f32.mrf.mxu2  ;;  %1154 = vmatmul.f32.gmra.mxu0 %v3233_v17  ;;  %1267 = vmatmul.f32.gmra.mxu1 %v3234_v50  ;;  %v1446_v29 = vpop.f32.mrf.mxu3 }
 0x20e   : > { %v1334_v30 = vadd.f32 %v1333_v16, %v1221_v13  ;;  %v3256_v16 = vld [vmem:[#allocation81_spill] sm:$0xff] }
 0x210   : > { %v1447_v24 = vadd.f32 %v1446_v29, %v1334_v30  ;;  %v3257_v29 = vld [vmem:[#allocation82_spill] sm:$0xff]  ;;  %v3258_v30 = vld [vmem:[#allocation83_spill] sm:$0xff] }
 0x212   : > { %1730 = vst [vmem:[%s2598_s19 + $0x88] sm:$0xff] %v1447_v24  ;;  %1383 = vmatmul.f32.gmra.mxu2 %v3235_v31  ;;  %v1110_v9 = vpop.f32.mrf.mxu0  ;;  %v1223_v25 = vpop.f32.mrf.mxu1  ;;  %1496 = vmatmul.f32.gmra.mxu3 %v3236_v63 }
 0x213   : > { %v1224_v26 = vadd.f32 %v1223_v25, %v1110_v9  ;;  %v3259_v25 = vld [vmem:[#allocation84_spill] sm:$0xff] }
 0x215   : > { %v1336_v27 = vpop.f32.mrf.mxu2  ;;  %1157 = vmatmul.f32.gmra.mxu0 %v3237_v32  ;;  %1270 = vmatmul.f32.gmra.mxu1 %v3238_v60  ;;  %v1449_v33 = vpop.f32.mrf.mxu3 }
 0x216   : > { %v1337_v34 = vadd.f32 %v1336_v27, %v1224_v26  ;;  %v3260_v27 = vld [vmem:[#allocation85_spill] sm:$0xff] }
 0x218   : > { %v1450_v35 = vadd.f32 %v1449_v33, %v1337_v34  ;;  %v3261_v33 = vld [vmem:[#allocation86_spill] sm:$0xff]  ;;  %v3262_v34 = vld [vmem:[#allocation87_spill] sm:$0xff] }
 0x21a   : > { %1732 = vst [vmem:[%s2598_s19 + $0x98] sm:$0xff] %v1450_v35  ;;  %1386 = vmatmul.f32.gmra.mxu2 %v3239_v39  ;;  %v1113_v48 = vpop.f32.mrf.mxu0  ;;  %v1226_v40 = vpop.f32.mrf.mxu1  ;;  %1499 = vmatmul.f32.gmra.mxu3 %v3240_v61 }
 0x21b   : > { %v1227_v41 = vadd.f32 %v1226_v40, %v1113_v48 }
 0x21d   : > { %v1339_v42 = vpop.f32.mrf.mxu2  ;;  %1160 = vmatmul.f32.gmra.mxu0 %v3241_v43  ;;  %1273 = vmatmul.f32.gmra.mxu1 %v3242_v11  ;;  %v1452_v49 = vpop.f32.mrf.mxu3 }
 0x21e   : > { %v1340_v44 = vadd.f32 %v1339_v42, %v1227_v41 }
 0x220   : > { %v1453_v51 = vadd.f32 %v1452_v49, %v1340_v44 }
 0x222   : > { %1734 = vst [vmem:[%s2598_s19 + $0xa8] sm:$0xff] %v1453_v51  ;;  %1389 = vmatmul.f32.gmra.mxu2 %v3243_v45  ;;  %v1116_v46 = vpop.f32.mrf.mxu0  ;;  %v1229_v47 = vpop.f32.mrf.mxu1  ;;  %1502 = vmatmul.f32.gmra.mxu3 %v3244_v14 }
 0x223   : > { %v1230_v37 = vadd.f32 %v1229_v47, %v1116_v46 }
 0x225   : > { %v1342_v52 = vpop.f32.mrf.mxu2  ;;  %1163 = vmatmul.f32.gmra.mxu0 %v3245_v15  ;;  %1276 = vmatmul.f32.gmra.mxu1 %v3246_v53  ;;  %v1455_v54 = vpop.f32.mrf.mxu3 }
 0x226   : > { %v1343_v55 = vadd.f32 %v1342_v52, %v1230_v37 }
 0x228   : > { %v1456_v18 = vadd.f32 %v1455_v54, %v1343_v55 }
 0x22a   : > { %1736 = vst [vmem:[%s2598_s19 + $0xb8] sm:$0xff] %v1456_v18  ;;  %1392 = vmatmul.f32.gmra.mxu2 %v3247_v19  ;;  %v1119_v56 = vpop.f32.mrf.mxu0  ;;  %v1232_v8 = vpop.f32.mrf.mxu1  ;;  %1505 = vmatmul.f32.gmra.mxu3 %v3248_v57 }
 0x22b   : > { %v1233_v58 = vadd.f32 %v1232_v8, %v1119_v56 }
 0x22d   : > { %v1345_v59 = vpop.f32.mrf.mxu2  ;;  %1166 = vmatmul.f32.gmra.mxu0 %v3249_v10  ;;  %1279 = vmatmul.f32.gmra.mxu1 %v3250_v20  ;;  %v1458_v0 = vpop.f32.mrf.mxu3 }
 0x22e   : > { %v1346_v36 = vadd.f32 %v1345_v59, %v1233_v58 }
 0x230   : > { %v1459_v1 = vadd.f32 %v1458_v0, %v1346_v36 }
 0x232   : > { %1738 = vst [vmem:[%s2598_s19 + $0xc8] sm:$0xff] %v1459_v1  ;;  %1395 = vmatmul.f32.gmra.mxu2 %v3251_v2  ;;  %v1122_v3 = vpop.f32.mrf.mxu0  ;;  %v1235_v21 = vpop.f32.mrf.mxu1  ;;  %1508 = vmatmul.f32.gmra.mxu3 %v3252_v22 }
 0x233   : > { %v1236_v4 = vadd.f32 %v1235_v21, %v1122_v3 }
 0x235   : > { %v1348_v23 = vpop.f32.mrf.mxu2  ;;  %1169 = vmatmul.f32.gmra.mxu0 %v3253_v5  ;;  %1282 = vmatmul.f32.gmra.mxu1 %v3254_v6  ;;  %v1461_v7 = vpop.f32.mrf.mxu3 }
 0x236   : > { %v1349_v62 = vadd.f32 %v1348_v23, %v1236_v4 }
 0x238   : > { %v1462_v38 = vadd.f32 %v1461_v7, %v1349_v62 }
 0x23a   : > { %1740 = vst [vmem:[%s2598_s19 + $0xd8] sm:$0xff] %v1462_v38  ;;  %1398 = vmatmul.f32.gmra.mxu2 %v3255_v12  ;;  %v1125_v28 = vpop.f32.mrf.mxu0  ;;  %v1238_v13 = vpop.f32.mrf.mxu1  ;;  %1511 = vmatmul.f32.gmra.mxu3 %v3256_v16 }
 0x23b   : > { %v1239_v17 = vadd.f32 %v1238_v13, %v1125_v28 }
 0x23d   : > { %v1351_v50 = vpop.f32.mrf.mxu2  ;;  %1172 = vmatmul.f32.gmra.mxu0 %v3257_v29  ;;  %1285 = vmatmul.f32.gmra.mxu1 %v3258_v30  ;;  %v1464_v24 = vpop.f32.mrf.mxu3 }
 0x23e   : > { %v1352_v31 = vadd.f32 %v1351_v50, %v1239_v17 }
 0x240   : > { %v1465_v9 = vadd.f32 %v1464_v24, %v1352_v31 }
 0x242   : > { %1742 = vst [vmem:[%s2598_s19 + $0xe8] sm:$0xff] %v1465_v9  ;;  %1401 = vmatmul.f32.gmra.mxu2 %v3259_v25  ;;  %v1128_v63 = vpop.f32.mrf.mxu0  ;;  %v1241_v26 = vpop.f32.mrf.mxu1  ;;  %1514 = vmatmul.f32.gmra.mxu3 %v3260_v27 }
 0x243   : > { %v1242_v32 = vadd.f32 %v1241_v26, %v1128_v63 }
 0x245   : > { %v1354_v60 = vpop.f32.mrf.mxu2  ;;  %1175 = vmatmul.f32.gmra.mxu0 %v3261_v33  ;;  %1288 = vmatmul.f32.gmra.mxu1 %v3262_v34  ;;  %v1467_v35 = vpop.f32.mrf.mxu3 }
 0x246   : > { %v1355_v39 = vadd.f32 %v1354_v60, %v1242_v32 }
 0x248   : > { %v1468_v48 = vadd.f32 %v1467_v35, %v1355_v39 }
 0x24a   : > { %1744 = vst [vmem:[%s2598_s19 + $0xf8] sm:$0xff] %v1468_v48  ;;  %v1131_v40 = vpop.f32.mrf.mxu0  ;;  %v1244_v61 = vpop.f32.mrf.mxu1 }
 0x24b   : > { %v1245_v41 = vadd.f32 %v1244_v61, %v1131_v40 }
 0x24d   : > { %v1357_v42 = vpop.f32.mrf.mxu2  ;;  %v1470_v43 = vpop.f32.mrf.mxu3 }
 0x24e   : > { %v1358_v11 = vadd.f32 %v1357_v42, %v1245_v41 }
 0x250   : > { %v1471_v49 = vadd.f32 %v1470_v43, %v1358_v11 }
 0x252   : > { %1746 = vst [vmem:[%s2598_s19 + $0x108] sm:$0xff] %v1471_v49  ;;  %v1134_v44 = vpop.f32.mrf.mxu0  ;;  %v1247_v51 = vpop.f32.mrf.mxu1 }
 0x253   : > { %v1248_v45 = vadd.f32 %v1247_v51, %v1134_v44 }
 0x255   : > { %v1360_v46 = vpop.f32.mrf.mxu2  ;;  %v1473_v47 = vpop.f32.mrf.mxu3 }
 0x256   : > { %v1361_v14 = vadd.f32 %v1360_v46, %v1248_v45 }
 0x258   : > { %v1474_v37 = vadd.f32 %v1473_v47, %v1361_v14 }
 0x25a   : > { %1748 = vst [vmem:[%s2598_s19 + $0x118] sm:$0xff] %v1474_v37  ;;  %v1137_v52 = vpop.f32.mrf.mxu0  ;;  %v1250_v15 = vpop.f32.mrf.mxu1 }
 0x25b   : > { %v1251_v53 = vadd.f32 %v1250_v15, %v1137_v52 }
 0x25d   : > { %v1363_v54 = vpop.f32.mrf.mxu2  ;;  %v1476_v55 = vpop.f32.mrf.mxu3 }
 0x25e   : > { %v1364_v18 = vadd.f32 %v1363_v54, %v1251_v53 }
 0x260   : > { %v1477_v19 = vadd.f32 %v1476_v55, %v1364_v18 }
 0x262   : > { %1750 = vst [vmem:[%s2598_s19 + $0x128] sm:$0xff] %v1477_v19  ;;  %v1140_v56 = vpop.f32.mrf.mxu0  ;;  %v1253_v8 = vpop.f32.mrf.mxu1 }
 0x263   : > { %v1254_v57 = vadd.f32 %v1253_v8, %v1140_v56 }
 0x265   : > { %v1366_v58 = vpop.f32.mrf.mxu2  ;;  %v1479_v59 = vpop.f32.mrf.mxu3 }
 0x266   : > { %v1367_v10 = vadd.f32 %v1366_v58, %v1254_v57 }
 0x268   : > { %v1480_v20 = vadd.f32 %v1479_v59, %v1367_v10 }
 0x26a   : > { %1752 = vst [vmem:[%s2598_s19 + $0x138] sm:$0xff] %v1480_v20  ;;  %v1143_v0 = vpop.f32.mrf.mxu0  ;;  %v1256_v36 = vpop.f32.mrf.mxu1 }
 0x26b   : > { %v1257_v1 = vadd.f32 %v1256_v36, %v1143_v0 }
 0x26d   : > { %v1369_v2 = vpop.f32.mrf.mxu2  ;;  %v1482_v3 = vpop.f32.mrf.mxu3 }
 0x26e   : > { %v1370_v21 = vadd.f32 %v1369_v2, %v1257_v1 }
 0x270   : > { %v1483_v22 = vadd.f32 %v1482_v3, %v1370_v21 }
 0x272   : > { %1754 = vst [vmem:[%s2598_s19 + $0x148] sm:$0xff] %v1483_v22  ;;  %v1146_v4 = vpop.f32.mrf.mxu0  ;;  %v1259_v23 = vpop.f32.mrf.mxu1 }
 0x273   : > { %v1260_v5 = vadd.f32 %v1259_v23, %v1146_v4 }
 0x275   : > { %v1372_v6 = vpop.f32.mrf.mxu2  ;;  %v1485_v7 = vpop.f32.mrf.mxu3 }
 0x276   : > { %v1373_v62 = vadd.f32 %v1372_v6, %v1260_v5 }
 0x278   : > { %v1486_v38 = vadd.f32 %v1485_v7, %v1373_v62 }
 0x27a   : > { %1756 = vst [vmem:[%s2598_s19 + $0x158] sm:$0xff] %v1486_v38  ;;  %v1149_v12 = vpop.f32.mrf.mxu0  ;;  %v1262_v28 = vpop.f32.mrf.mxu1 }
 0x27b   : > { %v1263_v13 = vadd.f32 %v1262_v28, %v1149_v12 }
 0x27d   : > { %v1375_v16 = vpop.f32.mrf.mxu2  ;;  %v1488_v17 = vpop.f32.mrf.mxu3 }
 0x27e   : > { %v1376_v50 = vadd.f32 %v1375_v16, %v1263_v13 }
 0x280   : > { %v1489_v29 = vadd.f32 %v1488_v17, %v1376_v50 }
 0x282   : > { %1758 = vst [vmem:[%s2598_s19 + $0x168] sm:$0xff] %v1489_v29  ;;  %v1152_v30 = vpop.f32.mrf.mxu0  ;;  %v1265_v24 = vpop.f32.mrf.mxu1 }
 0x283   : > { %v1266_v31 = vadd.f32 %v1265_v24, %v1152_v30 }
 0x285   : > { %v1378_v9 = vpop.f32.mrf.mxu2  ;;  %v1491_v25 = vpop.f32.mrf.mxu3 }
 0x286   : > { %v1379_v63 = vadd.f32 %v1378_v9, %v1266_v31 }
 0x288   : > { %v1492_v26 = vadd.f32 %v1491_v25, %v1379_v63 }
 0x28a   : > { %1760 = vst [vmem:[%s2598_s19 + $0x178] sm:$0xff] %v1492_v26  ;;  %v1155_v27 = vpop.f32.mrf.mxu0  ;;  %v1268_v32 = vpop.f32.mrf.mxu1 }
 0x28b   : > { %v1269_v60 = vadd.f32 %v1268_v32, %v1155_v27 }
 0x28d   : > { %v1381_v33 = vpop.f32.mrf.mxu2  ;;  %v1494_v34 = vpop.f32.mrf.mxu3 }
 0x28e   : > { %v1382_v35 = vadd.f32 %v1381_v33, %v1269_v60 }
 0x290   : > { %v1495_v39 = vadd.f32 %v1494_v34, %v1382_v35 }
 0x292   : > { %1762 = vst [vmem:[%s2598_s19 + $0x188] sm:$0xff] %v1495_v39  ;;  %v1158_v48 = vpop.f32.mrf.mxu0  ;;  %v1271_v40 = vpop.f32.mrf.mxu1 }
 0x293   : > { %v1272_v61 = vadd.f32 %v1271_v40, %v1158_v48 }
 0x295   : > { %v1384_v41 = vpop.f32.mrf.mxu2  ;;  %v1497_v42 = vpop.f32.mrf.mxu3 }
 0x296   : > { %v1385_v43 = vadd.f32 %v1384_v41, %v1272_v61 }
 0x298   : > { %v1498_v11 = vadd.f32 %v1497_v42, %v1385_v43 }
 0x29a   : > { %1764 = vst [vmem:[%s2598_s19 + $0x198] sm:$0xff] %v1498_v11  ;;  %v1161_v49 = vpop.f32.mrf.mxu0  ;;  %v1274_v44 = vpop.f32.mrf.mxu1 }
 0x29b   : > { %v1275_v51 = vadd.f32 %v1274_v44, %v1161_v49 }
 0x29d   : > { %v1387_v45 = vpop.f32.mrf.mxu2  ;;  %v1500_v46 = vpop.f32.mrf.mxu3 }
 0x29e   : > { %v1388_v47 = vadd.f32 %v1387_v45, %v1275_v51 }
 0x2a0   : > { %v1501_v14 = vadd.f32 %v1500_v46, %v1388_v47 }
 0x2a2   : > { %1766 = vst [vmem:[%s2598_s19 + $0x1a8] sm:$0xff] %v1501_v14  ;;  %v1164_v37 = vpop.f32.mrf.mxu0  ;;  %v1277_v52 = vpop.f32.mrf.mxu1 }
 0x2a3   : > { %v1278_v15 = vadd.f32 %v1277_v52, %v1164_v37 }
 0x2a5   : > { %v1390_v53 = vpop.f32.mrf.mxu2  ;;  %v1503_v54 = vpop.f32.mrf.mxu3 }
 0x2a6   : > { %v1391_v55 = vadd.f32 %v1390_v53, %v1278_v15 }
 0x2a8   : > { %v1504_v18 = vadd.f32 %v1503_v54, %v1391_v55 }
 0x2aa   : > { %1768 = vst [vmem:[%s2598_s19 + $0x1b8] sm:$0xff] %v1504_v18  ;;  %v1167_v19 = vpop.f32.mrf.mxu0  ;;  %v1280_v56 = vpop.f32.mrf.mxu1 }
 0x2ab   : > { %v1281_v8 = vadd.f32 %v1280_v56, %v1167_v19 }
 0x2ad   : > { %v1393_v57 = vpop.f32.mrf.mxu2  ;;  %v1506_v58 = vpop.f32.mrf.mxu3 }
 0x2ae   : > { %v1394_v59 = vadd.f32 %v1393_v57, %v1281_v8 }
 0x2b0   : > { %v1507_v10 = vadd.f32 %v1506_v58, %v1394_v59 }
 0x2b2   : > { %1770 = vst [vmem:[%s2598_s19 + $0x1c8] sm:$0xff] %v1507_v10  ;;  %v1170_v20 = vpop.f32.mrf.mxu0  ;;  %v1283_v0 = vpop.f32.mrf.mxu1 }
 0x2b3   : > { %v1284_v36 = vadd.f32 %v1283_v0, %v1170_v20 }
 0x2b5   : > { %v1396_v1 = vpop.f32.mrf.mxu2  ;;  %v1509_v2 = vpop.f32.mrf.mxu3 }
 0x2b6   : > { %v1397_v3 = vadd.f32 %v1396_v1, %v1284_v36 }
 0x2b8   : > { %v1510_v21 = vadd.f32 %v1509_v2, %v1397_v3 }
 0x2ba   : > { %1772 = vst [vmem:[%s2598_s19 + $0x1d8] sm:$0xff] %v1510_v21  ;;  %v1173_v22 = vpop.f32.mrf.mxu0  ;;  %v1286_v4 = vpop.f32.mrf.mxu1 }
 0x2bb   : > { %v1287_v23 = vadd.f32 %v1286_v4, %v1173_v22 }
 0x2bd   : > { %v1399_v5 = vpop.f32.mrf.mxu2  ;;  %v1512_v6 = vpop.f32.mrf.mxu3 }
 0x2be   : > { %v1400_v7 = vadd.f32 %v1399_v5, %v1287_v23 }
 0x2c0   : > { %v1513_v62 = vadd.f32 %v1512_v6, %v1400_v7 }
 0x2c2   : > { %1774 = vst [vmem:[%s2598_s19 + $0x1e8] sm:$0xff] %v1513_v62  ;;  %v1176_v38 = vpop.f32.mrf.mxu0  ;;  %v1289_v12 = vpop.f32.mrf.mxu1 }
 0x2c3   : > { %v1290_v28 = vadd.f32 %v1289_v12, %v1176_v38 }
 0x2c5   : > { %v1402_v13 = vpop.f32.mrf.mxu2  ;;  %v1515_v16 = vpop.f32.mrf.mxu3 }
 0x2c6   : > { %v1403_v17 = vadd.f32 %v1402_v13, %v1290_v28 }
 0x2c8   : > { %v1516_v50 = vadd.f32 %v1515_v16, %v1403_v17 }
 0x2ca   : > { %1776 = vst [vmem:[%s2598_s19 + $0x1f8] sm:$0xff] %v1516_v50 }
 0x2cb   : > { %2093 = shalt.err (!%p2090_p0)
}
 0x2cc   : > { %s2159_s30 = smov 256   ;;  %s2160_s6 = smov 512  }
 0x2cd   : > { %s2161_s7 = smov 16  }
 0x2ce   : > { %1928 = dma.vmem_to_hbm [thread:$0]  (%p2258_p5), %s1794_s21, 8192, %s1796_s22, %s1778_s12, %s2159_s30, %s2160_s6, %s2161_s7  }
 0x2cf PF: > { %s1810_s17 = sand.u32 1, %s2132_s9   ;;  %p1939_p3 = pnand %p1907_p11, %p2226_p6 }
 0x2d0   : > { %s1811_s19 = scalar_lea.sflag [#allocation5], %s1810_s17 }
 0x2d1   : > { %p1940_p7 = pneg %p1939_p3 }
 0x2d3   : > { %2127 = dma.done.wait (%p1940_p7), %s1811_s19, 8192  }
 0x2d4   : > { %2129 = vsyncadd (%p1940_p7), %s1811_s19, 4294959104  ;;  %s19_s14 = sadd.s32 1, %s2152_s14   ;;  %s3263_s9 = smov %s2136_s10 }
 0x2d5   : > { %p16_p9 = scmp.ge.s32.totalorder %s19_s14, 4   ;;  %s3264_s10 = smov %s2140_s11 }
 0x2d6   : > { %s3265_s11 = smov %s2267_s8  ;;  %s3266_s12 = smov %s2148_s13 }
 0x2d7   : > { %s3267_s13 = smov %s3269_s29  ;;  %18 = sbr.rel (!%p16_p9) target bundleno = 7 (0x7), region = 87 }
 0x2dc   :  { %1817 = vsyncpa [#allocation4], 1 }
 0x2dd   :  { %1819 = vsyncpa [#allocation4 + $0x1], 1 }
 0x2de   :  { %1820 = vsyncpa [#allocation7], 1 }
 0x2df   :  { %1822 = vsyncpa [#allocation7 + $0x1], 1 }
 0x2e0   :  { %1823 = vsyncpa [#allocation5], 1 }
 0x2e1   :  { %1825 = vsyncpa [#allocation5 + $0x1], 1 }

</bundles_post_ra>
